<compile_context>
chip_gen: v7x
topology: tpu7x:2x2x1
jax: 0.10.0
libtpu: 0.0.40
codegen_flags: <defaults>
</compile_context>

<pallas_src>
import functools

import jax
import jax.numpy as jnp
from jax.experimental import pallas as pl
from jax.experimental.pallas import tpu as pltpu

LN_EPS = 1e-5      # PyTorch nn.LayerNorm default
NEG_INF = -1e30    # bias for padded action lanes -> exp underflows to exactly 0


def _round_up(x, m):
    return ((x + m - 1) // m) * m


def _layernorm(x, gamma, beta):
    # Fused single-pass statistics (one XLU reduction chain instead of two):
    #   mean = E[x],  var = E[x^2] - mean^2  (clamped at 0).
    # f32 throughout; post-ReLU inputs keep the cancellation risk negligible.
    inv_n = 1.0 / x.shape[-1]
    s1 = jnp.sum(x, axis=-1, keepdims=True)
    s2 = jnp.sum(x * x, axis=-1, keepdims=True)
    mean = s1 * inv_n
    var = jnp.maximum(s2 * inv_n - mean * mean, 0.0)
    inv = jax.lax.rsqrt(var + LN_EPS)
    return (x - mean) * inv * gamma + beta


def actor_kernel(s_ref, w1_ref, b1_ref, w3_ref, b3_ref,
                 g_ref, be_ref, w2_ref, b2_ref, out_ref, *, fc1_on_vpu):
    cdt = w3_ref.dtype                 # MXU operand dtype (bf16 default / f32)
    # Hoist the (1, F) parameter rows once per grid step and reuse.
    gamma = g_ref[...]
    beta = be_ref[...]
    b1 = b1_ref[...]
    b3 = b3_ref[...]
    b2 = b2_ref[...]

    # ---- fc1 -> relu -> layernorm --------------------------------------
    if fc1_on_vpu:
        # K = state_dim is tiny: an MXU matmul would run at ~6% systolic fill
        # yet still cost full pushes.  Do K broadcast-FMA accumulations on the
        # VPU instead (exact f32).  K is static -> unrolled Python loop.
        s = s_ref[...]                 # (TB, S) f32
        w1 = w1_ref[...]               # (S,  H) f32
        h = s[:, 0:1] * w1[0:1, :]
        for k in range(1, s.shape[1]):
            h = h + s[:, k:k + 1] * w1[k:k + 1, :]
        h = h + b1
    else:
        h = jnp.dot(s_ref[...], w1_ref[...],
                    preferred_element_type=jnp.float32) + b1
    x = _layernorm(jnp.maximum(h, 0.0), gamma, beta)

    # ---- fc3 -> relu -> layernorm (same LN params, exactly as the module) ----
    h = jnp.dot(x.astype(cdt), w3_ref[...],
                preferred_element_type=jnp.float32) + b3
    x = _layernorm(jnp.maximum(h, 0.0), gamma, beta)

    # ---- fc2 -> softmax over last axis ----------------------------------
    # Padded action lanes carry a -1e30 bias, so exp() is exactly 0 there and
    # the softmax matches the unpadded one; the store is a full-lane vst.
    logits = jnp.dot(x.astype(cdt), w2_ref[...],
                     preferred_element_type=jnp.float32) + b2
    m = jnp.max(logits, axis=-1, keepdims=True)
    e = jnp.exp(logits - m)
    d = jnp.sum(e, axis=-1, keepdims=True)
    r = pl.reciprocal(d, approx=True)      # EUP vrcp -> VALU slot stays free
    r = r * (2.0 - d * r)                  # one Newton step: ~1e-7 rel error
    out_ref[...] = (e * r).astype(out_ref.dtype)


@functools.partial(
    jax.jit,
    static_argnames=("batch_tile", "matmul_dtype", "out_dtype",
                     "fc1_on_vpu", "return_padded"))
def actor_forward(s, params, *, batch_tile=1024, matmul_dtype=jnp.bfloat16,
                  out_dtype=jnp.float32, fc1_on_vpu=None, return_padded=False):
    """s: (B, state_dim) f32.  params: dict from make_params (weights (in, out))."""
    B, S = s.shape
    H = params["w1"].shape[1]
    A = params["w2"].shape[1]

    if fc1_on_vpu is None:
        fc1_on_vpu = S <= 32   # tiny contraction dim -> VPU broadcast-FMA path

    # ---- wrapper-side layout prep (once per call, outside the kernel) -------
    # Lane-dense output: pad the action dim up to a multiple of 128.
    A_pad = _round_up(max(A, 128), 128)
    w2 = params["w2"]
    b2 = params["b2"]
    if A_pad != A:
        w2 = jnp.pad(w2, ((0, 0), (0, A_pad - A)))
        b2 = jnp.pad(b2, ((0, 0), (0, A_pad - A)), constant_values=NEG_INF)

    # Cast MXU weights once here (bf16 is the MXU fast path on v6e/v7x).
    w2 = w2.astype(matmul_dtype)
    w3 = params["w3"].astype(matmul_dtype)
    if fc1_on_vpu:
        w1, s_in = params["w1"], s                       # exact f32 VPU path
    else:
        w1, s_in = params["w1"].astype(matmul_dtype), s.astype(matmul_dtype)

    # Batch tiling: NO wrapper-side padding of s.  grid = cdiv(B, TB); Pallas
    # masks the ragged last tile on writeback (all ops are row-independent and
    # pad rows never reach the real output).  Cap TB so the grid keeps >= 2
    # steps when the batch allows it (v7x has 2 TensorCores); keep tiles
    # sublane-aligned (multiple of 8).
    batch_tile = max(8, _round_up(batch_tile, 8))
    TB = min(batch_tile, _round_up(pl.cdiv(B, 2), 8))
    if TB >= B:
        TB = B          # single full-extent block for small batches
    grid = (pl.cdiv(B, TB),)

    def resident(shape):
        # Same block every grid step -> stays VMEM-resident across the grid.
        # (pl.Buffered(1) would drop the redundant second buffer, ~0.6 MiB;
        #  left at the default pipelining for portability.)
        return pl.BlockSpec(shape, lambda i: (0, 0))

    kernel = functools.partial(actor_kernel, fc1_on_vpu=fc1_on_vpu)

    out = pl.pallas_call(
        kernel,
        out_shape=jax.ShapeDtypeStruct((B, A_pad), out_dtype),
        grid=grid,
        in_specs=[
            pl.BlockSpec((TB, S), lambda i: (i, 0)),   # s: tiled over batch
            resident((S, H)),                          # w1
            resident((1, H)),                          # b1
            resident((H, H)),                          # w3
            resident((1, H)),                          # b3
            resident((1, H)),                          # gamma
            resident((1, H)),                          # beta
            resident((H, A_pad)),                      # w2 (lane-padded)
            resident((1, A_pad)),                      # b2 (lane-padded, -1e30)
        ],
        out_specs=pl.BlockSpec((TB, A_pad), lambda i: (i, 0)),
        compiler_params=pltpu.CompilerParams(
            dimension_semantics=("parallel",),         # megacore sharding on v7x
        ),
    )(s_in, w1, params["b1"], w3, params["b3"],
      params["gamma"], params["beta"], w2, b2)

    if return_padded:
        return out              # (B, A_pad): skip the XLA [:, :A] slice copy
    return out[:, :A]


def make_params(key, state_dim, action_dim, hidden=300):
    ks = jax.random.split(key, 6)
    scale1 = 1.0 / jnp.sqrt(state_dim)
    scaleh = 1.0 / jnp.sqrt(hidden)
    return {
        "w1": jax.random.uniform(ks[0], (state_dim, hidden), jnp.float32, -scale1, scale1),
        "b1": jax.random.uniform(ks[1], (1, hidden), jnp.float32, -scale1, scale1),
        "w3": jax.random.uniform(ks[2], (hidden, hidden), jnp.float32, -scaleh, scaleh),
        "b3": jax.random.uniform(ks[3], (1, hidden), jnp.float32, -scaleh, scaleh),
        "w2": jax.random.uniform(ks[4], (hidden, action_dim), jnp.float32, -scaleh, scaleh),
        "b2": jax.random.uniform(ks[5], (1, action_dim), jnp.float32, -scaleh, scaleh),
        "gamma": jnp.ones((1, hidden), jnp.float32),   # nn.LayerNorm default init
        "beta": jnp.zeros((1, hidden), jnp.float32),
    }


def actor_ref(s, p):
    # Pure-JAX f32 reference (two-pass LayerNorm) for correctness checking.
    def ln(x):
        mu = jnp.mean(x, axis=-1, keepdims=True)
        var = jnp.mean((x - mu) ** 2, axis=-1, keepdims=True)
        return (x - mu) / jnp.sqrt(var + LN_EPS) * p["gamma"] + p["beta"]
    x = ln(jnp.maximum(s @ p["w1"] + p["b1"], 0.0))
    x = ln(jnp.maximum(x @ p["w3"] + p["b3"], 0.0))
    return jax.nn.softmax(x @ p["w2"] + p["b2"], axis=-1)


if __name__ == "__main__":
    key = jax.random.PRNGKey(0)
    k_params, k_s1, k_s2 = jax.random.split(key, 3)

    state_dim, action_dim = 16, 8
    params = make_params(k_params, state_dim, action_dim)

    # --- small case matching the toy module sizes (batch=2, single grid step) ---
    s_small = jax.random.normal(k_s1, (2, state_dim), jnp.float32)
    ref_small = actor_ref(s_small, params)

    # exact path: f32 MXU operands, tight tolerance
    out_f32 = jax.block_until_ready(
        actor_forward(s_small, params, matmul_dtype=jnp.float32))
    assert out_f32.shape == (2, action_dim)
    assert jnp.allclose(jnp.sum(out_f32, axis=-1), 1.0, atol=1e-5)
    assert jnp.allclose(out_f32, ref_small, atol=3e-5, rtol=1e-4)

    # default path: bf16 MXU operands (fast path on v6e/v7x)
    out_def = jax.block_until_ready(actor_forward(s_small, params))
    assert out_def.shape == (2, action_dim)
    assert jnp.allclose(jnp.sum(out_def, axis=-1), 1.0, atol=1e-3)
    assert jnp.allclose(out_def, ref_small, atol=5e-2)

    # --- larger batch: multi-step grid (3 steps), ragged last tile, no pad ------
    s_big = jax.random.normal(k_s2, (300, state_dim), jnp.float32)
    ref_big = actor_ref(s_big, params)

    out_big = jax.block_until_ready(
        actor_forward(s_big, params, batch_tile=128, matmul_dtype=jnp.float32))
    assert out_big.shape == (300, action_dim)
    assert jnp.allclose(jnp.sum(out_big, axis=-1), 1.0, atol=1e-5)
    assert jnp.allclose(out_big, ref_big, atol=1e-4, rtol=1e-4)

    out_big_bf = jax.block_until_ready(actor_forward(s_big, params, batch_tile=128))
    assert out_big_bf.shape == (300, action_dim)
    assert jnp.allclose(out_big_bf, ref_big, atol=5e-2)

    # --- bf16 output path (halves the dominant HBM writeback; useful on v5e) ----
    out_bf16o = jax.block_until_ready(
        actor_forward(s_big, params, batch_tile=128, out_dtype=jnp.bfloat16))
    assert out_bf16o.dtype == jnp.bfloat16
    assert jnp.allclose(jnp.sum(out_bf16o.astype(jnp.float32), axis=-1), 1.0, atol=2e-2)
    assert jnp.allclose(out_bf16o.astype(jnp.float32), ref_big, atol=5e-2)

    # --- padded-output path (downstream consumes the lane-dense (B,128) buffer) --
    out_pad = jax.block_until_ready(actor_forward(s_small, params, return_padded=True))
    assert out_pad.shape == (2, 128)
    assert jnp.allclose(out_pad[:, :action_dim], out_def, atol=1e-6)
    assert jnp.allclose(out_pad[:, action_dim:], 0.0)

    print("KERNEL_OK")
</pallas_src>

<mosaic_0001>
module attributes {stable_mosaic.version = 11 : i64} {
  func.func @actor_kernel(%arg0: i32, %arg1: memref<2x16xf32, #tpu.memory_space<vmem>>, %arg2: memref<16x300xf32, #tpu.memory_space<vmem>>, %arg3: memref<1x300xf32, #tpu.memory_space<vmem>>, %arg4: memref<300x300xf32, #tpu.memory_space<vmem>>, %arg5: memref<1x300xf32, #tpu.memory_space<vmem>>, %arg6: memref<1x300xf32, #tpu.memory_space<vmem>>, %arg7: memref<1x300xf32, #tpu.memory_space<vmem>>, %arg8: memref<300x128xf32, #tpu.memory_space<vmem>>, %arg9: memref<1x128xf32, #tpu.memory_space<vmem>>, %arg10: memref<2x128xf32, #tpu.memory_space<vmem>>) attributes {dimension_semantics = [#tpu.dimension_semantics<parallel>], iteration_bounds = array<i64: 1>, scalar_prefetch = 0 : i64, scratch_operands = 0 : i64, tpu.core_type = #tpu.core_type<tc>, window_params = [{transform_indices = @transform_0, window_bounds = array<i64: 2, 16>}, {pipeline_mode = #tpu.pipeline_mode<synchronous>, transform_indices = @transform_1, window_bounds = array<i64: 16, 300>}, {pipeline_mode = #tpu.pipeline_mode<synchronous>, transform_indices = @transform_2, window_bounds = array<i64: 1, 300>}, {pipeline_mode = #tpu.pipeline_mode<synchronous>, transform_indices = @transform_3, window_bounds = array<i64: 300, 300>}, {pipeline_mode = #tpu.pipeline_mode<synchronous>, transform_indices = @transform_4, window_bounds = array<i64: 1, 300>}, {pipeline_mode = #tpu.pipeline_mode<synchronous>, transform_indices = @transform_5, window_bounds = array<i64: 1, 300>}, {pipeline_mode = #tpu.pipeline_mode<synchronous>, transform_indices = @transform_6, window_bounds = array<i64: 1, 300>}, {pipeline_mode = #tpu.pipeline_mode<synchronous>, transform_indices = @transform_7, window_bounds = array<i64: 300, 128>}, {pipeline_mode = #tpu.pipeline_mode<synchronous>, transform_indices = @transform_8, window_bounds = array<i64: 1, 128>}, {transform_indices = @transform_9, window_bounds = array<i64: 2, 128>}]} {
    %c0 = arith.constant 0 : index
    %c0_0 = arith.constant 0 : index
    %0 = vector.load %arg6[%c0, %c0_0] : memref<1x300xf32, #tpu.memory_space<vmem>>, vector<1x300xf32>
    %c0_1 = arith.constant 0 : index
    %c0_2 = arith.constant 0 : index
    %1 = vector.load %arg7[%c0_1, %c0_2] : memref<1x300xf32, #tpu.memory_space<vmem>>, vector<1x300xf32>
    %c0_3 = arith.constant 0 : index
    %c0_4 = arith.constant 0 : index
    %2 = vector.load %arg3[%c0_3, %c0_4] : memref<1x300xf32, #tpu.memory_space<vmem>>, vector<1x300xf32>
    %c0_5 = arith.constant 0 : index
    %c0_6 = arith.constant 0 : index
    %3 = vector.load %arg5[%c0_5, %c0_6] : memref<1x300xf32, #tpu.memory_space<vmem>>, vector<1x300xf32>
    %c0_7 = arith.constant 0 : index
    %c0_8 = arith.constant 0 : index
    %4 = vector.load %arg9[%c0_7, %c0_8] : memref<1x128xf32, #tpu.memory_space<vmem>>, vector<1x128xf32>
    %c0_9 = arith.constant 0 : index
    %c0_10 = arith.constant 0 : index
    %5 = vector.load %arg1[%c0_9, %c0_10] : memref<2x16xf32, #tpu.memory_space<vmem>>, vector<2x16xf32>
    %c0_11 = arith.constant 0 : index
    %c0_12 = arith.constant 0 : index
    %6 = vector.load %arg2[%c0_11, %c0_12] : memref<16x300xf32, #tpu.memory_space<vmem>>, vector<16x300xf32>
    %7 = vector.extract_strided_slice %5 {offsets = [0, 0], sizes = [2, 1], strides = [1, 1]} : vector<2x16xf32> to vector<2x1xf32>
    %8 = vector.extract_strided_slice %6 {offsets = [0, 0], sizes = [1, 300], strides = [1, 1]} : vector<16x300xf32> to vector<1x300xf32>
    %9 = vector.broadcast %7 : vector<2x1xf32> to vector<2x300xf32>
    %10 = vector.broadcast %8 : vector<1x300xf32> to vector<2x300xf32>
    %11 = arith.mulf %9, %10 : vector<2x300xf32>
    %12 = vector.extract_strided_slice %5 {offsets = [0, 1], sizes = [2, 1], strides = [1, 1]} : vector<2x16xf32> to vector<2x1xf32>
    %13 = vector.extract_strided_slice %6 {offsets = [1, 0], sizes = [1, 300], strides = [1, 1]} : vector<16x300xf32> to vector<1x300xf32>
    %14 = vector.broadcast %12 : vector<2x1xf32> to vector<2x300xf32>
    %15 = vector.broadcast %13 : vector<1x300xf32> to vector<2x300xf32>
    %16 = arith.mulf %14, %15 : vector<2x300xf32>
    %17 = arith.addf %11, %16 : vector<2x300xf32>
    %18 = vector.extract_strided_slice %5 {offsets = [0, 2], sizes = [2, 1], strides = [1, 1]} : vector<2x16xf32> to vector<2x1xf32>
    %19 = vector.extract_strided_slice %6 {offsets = [2, 0], sizes = [1, 300], strides = [1, 1]} : vector<16x300xf32> to vector<1x300xf32>
    %20 = vector.broadcast %18 : vector<2x1xf32> to vector<2x300xf32>
    %21 = vector.broadcast %19 : vector<1x300xf32> to vector<2x300xf32>
    %22 = arith.mulf %20, %21 : vector<2x300xf32>
    %23 = arith.addf %17, %22 : vector<2x300xf32>
    %24 = vector.extract_strided_slice %5 {offsets = [0, 3], sizes = [2, 1], strides = [1, 1]} : vector<2x16xf32> to vector<2x1xf32>
    %25 = vector.extract_strided_slice %6 {offsets = [3, 0], sizes = [1, 300], strides = [1, 1]} : vector<16x300xf32> to vector<1x300xf32>
    %26 = vector.broadcast %24 : vector<2x1xf32> to vector<2x300xf32>
    %27 = vector.broadcast %25 : vector<1x300xf32> to vector<2x300xf32>
    %28 = arith.mulf %26, %27 : vector<2x300xf32>
    %29 = arith.addf %23, %28 : vector<2x300xf32>
    %30 = vector.extract_strided_slice %5 {offsets = [0, 4], sizes = [2, 1], strides = [1, 1]} : vector<2x16xf32> to vector<2x1xf32>
    %31 = vector.extract_strided_slice %6 {offsets = [4, 0], sizes = [1, 300], strides = [1, 1]} : vector<16x300xf32> to vector<1x300xf32>
    %32 = vector.broadcast %30 : vector<2x1xf32> to vector<2x300xf32>
    %33 = vector.broadcast %31 : vector<1x300xf32> to vector<2x300xf32>
    %34 = arith.mulf %32, %33 : vector<2x300xf32>
    %35 = arith.addf %29, %34 : vector<2x300xf32>
    %36 = vector.extract_strided_slice %5 {offsets = [0, 5], sizes = [2, 1], strides = [1, 1]} : vector<2x16xf32> to vector<2x1xf32>
    %37 = vector.extract_strided_slice %6 {offsets = [5, 0], sizes = [1, 300], strides = [1, 1]} : vector<16x300xf32> to vector<1x300xf32>
    %38 = vector.broadcast %36 : vector<2x1xf32> to vector<2x300xf32>
    %39 = vector.broadcast %37 : vector<1x300xf32> to vector<2x300xf32>
    %40 = arith.mulf %38, %39 : vector<2x300xf32>
    %41 = arith.addf %35, %40 : vector<2x300xf32>
    %42 = vector.extract_strided_slice %5 {offsets = [0, 6], sizes = [2, 1], strides = [1, 1]} : vector<2x16xf32> to vector<2x1xf32>
    %43 = vector.extract_strided_slice %6 {offsets = [6, 0], sizes = [1, 300], strides = [1, 1]} : vector<16x300xf32> to vector<1x300xf32>
    %44 = vector.broadcast %42 : vector<2x1xf32> to vector<2x300xf32>
    %45 = vector.broadcast %43 : vector<1x300xf32> to vector<2x300xf32>
    %46 = arith.mulf %44, %45 : vector<2x300xf32>
    %47 = arith.addf %41, %46 : vector<2x300xf32>
    %48 = vector.extract_strided_slice %5 {offsets = [0, 7], sizes = [2, 1], strides = [1, 1]} : vector<2x16xf32> to vector<2x1xf32>
    %49 = vector.extract_strided_slice %6 {offsets = [7, 0], sizes = [1, 300], strides = [1, 1]} : vector<16x300xf32> to vector<1x300xf32>
    %50 = vector.broadcast %48 : vector<2x1xf32> to vector<2x300xf32>
    %51 = vector.broadcast %49 : vector<1x300xf32> to vector<2x300xf32>
    %52 = arith.mulf %50, %51 : vector<2x300xf32>
    %53 = arith.addf %47, %52 : vector<2x300xf32>
    %54 = vector.extract_strided_slice %5 {offsets = [0, 8], sizes = [2, 1], strides = [1, 1]} : vector<2x16xf32> to vector<2x1xf32>
    %55 = vector.extract_strided_slice %6 {offsets = [8, 0], sizes = [1, 300], strides = [1, 1]} : vector<16x300xf32> to vector<1x300xf32>
    %56 = vector.broadcast %54 : vector<2x1xf32> to vector<2x300xf32>
    %57 = vector.broadcast %55 : vector<1x300xf32> to vector<2x300xf32>
    %58 = arith.mulf %56, %57 : vector<2x300xf32>
    %59 = arith.addf %53, %58 : vector<2x300xf32>
    %60 = vector.extract_strided_slice %5 {offsets = [0, 9], sizes = [2, 1], strides = [1, 1]} : vector<2x16xf32> to vector<2x1xf32>
    %61 = vector.extract_strided_slice %6 {offsets = [9, 0], sizes = [1, 300], strides = [1, 1]} : vector<16x300xf32> to vector<1x300xf32>
    %62 = vector.broadcast %60 : vector<2x1xf32> to vector<2x300xf32>
    %63 = vector.broadcast %61 : vector<1x300xf32> to vector<2x300xf32>
    %64 = arith.mulf %62, %63 : vector<2x300xf32>
    %65 = arith.addf %59, %64 : vector<2x300xf32>
    %66 = vector.extract_strided_slice %5 {offsets = [0, 10], sizes = [2, 1], strides = [1, 1]} : vector<2x16xf32> to vector<2x1xf32>
    %67 = vector.extract_strided_slice %6 {offsets = [10, 0], sizes = [1, 300], strides = [1, 1]} : vector<16x300xf32> to vector<1x300xf32>
    %68 = vector.broadcast %66 : vector<2x1xf32> to vector<2x300xf32>
    %69 = vector.broadcast %67 : vector<1x300xf32> to vector<2x300xf32>
    %70 = arith.mulf %68, %69 : vector<2x300xf32>
    %71 = arith.addf %65, %70 : vector<2x300xf32>
    %72 = vector.extract_strided_slice %5 {offsets = [0, 11], sizes = [2, 1], strides = [1, 1]} : vector<2x16xf32> to vector<2x1xf32>
    %73 = vector.extract_strided_slice %6 {offsets = [11, 0], sizes = [1, 300], strides = [1, 1]} : vector<16x300xf32> to vector<1x300xf32>
    %74 = vector.broadcast %72 : vector<2x1xf32> to vector<2x300xf32>
    %75 = vector.broadcast %73 : vector<1x300xf32> to vector<2x300xf32>
    %76 = arith.mulf %74, %75 : vector<2x300xf32>
    %77 = arith.addf %71, %76 : vector<2x300xf32>
    %78 = vector.extract_strided_slice %5 {offsets = [0, 12], sizes = [2, 1], strides = [1, 1]} : vector<2x16xf32> to vector<2x1xf32>
    %79 = vector.extract_strided_slice %6 {offsets = [12, 0], sizes = [1, 300], strides = [1, 1]} : vector<16x300xf32> to vector<1x300xf32>
    %80 = vector.broadcast %78 : vector<2x1xf32> to vector<2x300xf32>
    %81 = vector.broadcast %79 : vector<1x300xf32> to vector<2x300xf32>
    %82 = arith.mulf %80, %81 : vector<2x300xf32>
    %83 = arith.addf %77, %82 : vector<2x300xf32>
    %84 = vector.extract_strided_slice %5 {offsets = [0, 13], sizes = [2, 1], strides = [1, 1]} : vector<2x16xf32> to vector<2x1xf32>
    %85 = vector.extract_strided_slice %6 {offsets = [13, 0], sizes = [1, 300], strides = [1, 1]} : vector<16x300xf32> to vector<1x300xf32>
    %86 = vector.broadcast %84 : vector<2x1xf32> to vector<2x300xf32>
    %87 = vector.broadcast %85 : vector<1x300xf32> to vector<2x300xf32>
    %88 = arith.mulf %86, %87 : vector<2x300xf32>
    %89 = arith.addf %83, %88 : vector<2x300xf32>
    %90 = vector.extract_strided_slice %5 {offsets = [0, 14], sizes = [2, 1], strides = [1, 1]} : vector<2x16xf32> to vector<2x1xf32>
    %91 = vector.extract_strided_slice %6 {offsets = [14, 0], sizes = [1, 300], strides = [1, 1]} : vector<16x300xf32> to vector<1x300xf32>
    %92 = vector.broadcast %90 : vector<2x1xf32> to vector<2x300xf32>
    %93 = vector.broadcast %91 : vector<1x300xf32> to vector<2x300xf32>
    %94 = arith.mulf %92, %93 : vector<2x300xf32>
    %95 = arith.addf %89, %94 : vector<2x300xf32>
    %96 = vector.extract_strided_slice %5 {offsets = [0, 15], sizes = [2, 1], strides = [1, 1]} : vector<2x16xf32> to vector<2x1xf32>
    %97 = vector.extract_strided_slice %6 {offsets = [15, 0], sizes = [1, 300], strides = [1, 1]} : vector<16x300xf32> to vector<1x300xf32>
    %98 = vector.broadcast %96 : vector<2x1xf32> to vector<2x300xf32>
    %99 = vector.broadcast %97 : vector<1x300xf32> to vector<2x300xf32>
    %100 = arith.mulf %98, %99 : vector<2x300xf32>
    %101 = arith.addf %95, %100 : vector<2x300xf32>
    %102 = vector.broadcast %2 : vector<1x300xf32> to vector<2x300xf32>
    %103 = arith.addf %101, %102 : vector<2x300xf32>
    %cst = arith.constant 0.000000e+00 : f32
    %104 = vector.broadcast %cst : f32 to vector<2x300xf32>
    %105 = arith.maximumf %103, %104 : vector<2x300xf32>
    %cst_13 = arith.constant dense<0.000000e+00> : vector<2xf32>
    %106 = vector.multi_reduction <add>, %105, %cst_13 [1] : vector<2x300xf32> to vector<2xf32>
    %107 = vector.shape_cast %106 : vector<2xf32> to vector<2x1xf32>
    %108 = arith.mulf %105, %105 : vector<2x300xf32>
    %cst_14 = arith.constant dense<0.000000e+00> : vector<2xf32>
    %109 = vector.multi_reduction <add>, %108, %cst_14 [1] : vector<2x300xf32> to vector<2xf32>
    %110 = vector.shape_cast %109 : vector<2xf32> to vector<2x1xf32>
    %cst_15 = arith.constant 0.00333333341 : f32
    %111 = vector.broadcast %cst_15 : f32 to vector<2x1xf32>
    %112 = arith.mulf %107, %111 : vector<2x1xf32>
    %cst_16 = arith.constant 0.00333333341 : f32
    %113 = vector.broadcast %cst_16 : f32 to vector<2x1xf32>
    %114 = arith.mulf %110, %113 : vector<2x1xf32>
    %115 = arith.mulf %112, %112 : vector<2x1xf32>
    %116 = arith.subf %114, %115 : vector<2x1xf32>
    %cst_17 = arith.constant 0.000000e+00 : f32
    %117 = vector.broadcast %cst_17 : f32 to vector<2x1xf32>
    %118 = arith.maximumf %116, %117 : vector<2x1xf32>
    %cst_18 = arith.constant 9.99999974E-6 : f32
    %119 = vector.broadcast %cst_18 : f32 to vector<2x1xf32>
    %120 = arith.addf %118, %119 : vector<2x1xf32>
    %121 = math.rsqrt %120 : vector<2x1xf32>
    %122 = vector.broadcast %112 : vector<2x1xf32> to vector<2x300xf32>
    %123 = arith.subf %105, %122 : vector<2x300xf32>
    %124 = vector.broadcast %121 : vector<2x1xf32> to vector<2x300xf32>
    %125 = arith.mulf %123, %124 : vector<2x300xf32>
    %126 = vector.broadcast %0 : vector<1x300xf32> to vector<2x300xf32>
    %127 = arith.mulf %125, %126 : vector<2x300xf32>
    %128 = vector.broadcast %1 : vector<1x300xf32> to vector<2x300xf32>
    %129 = arith.addf %127, %128 : vector<2x300xf32>
    %c0_19 = arith.constant 0 : index
    %c0_20 = arith.constant 0 : index
    %130 = vector.load %arg4[%c0_19, %c0_20] : memref<300x300xf32, #tpu.memory_space<vmem>>, vector<300x300xf32>
    %cst_21 = arith.constant dense<0.000000e+00> : vector<2x300xf32>
    %131 = tpu.matmul %129, %130, %cst_21 {dimension_numbers = #tpu.dot_dimension_numbers<[1], [0], [0], [1], [0, 0, 1, 1], [], []>} : vector<2x300xf32>, vector<300x300xf32>, vector<2x300xf32> -> vector<2x300xf32>
    %132 = vector.broadcast %3 : vector<1x300xf32> to vector<2x300xf32>
    %133 = arith.addf %131, %132 : vector<2x300xf32>
    %cst_22 = arith.constant 0.000000e+00 : f32
    %134 = vector.broadcast %cst_22 : f32 to vector<2x300xf32>
    %135 = arith.maximumf %133, %134 : vector<2x300xf32>
    %cst_23 = arith.constant dense<0.000000e+00> : vector<2xf32>
    %136 = vector.multi_reduction <add>, %135, %cst_23 [1] : vector<2x300xf32> to vector<2xf32>
    %137 = vector.shape_cast %136 : vector<2xf32> to vector<2x1xf32>
    %138 = arith.mulf %135, %135 : vector<2x300xf32>
    %cst_24 = arith.constant dense<0.000000e+00> : vector<2xf32>
    %139 = vector.multi_reduction <add>, %138, %cst_24 [1] : vector<2x300xf32> to vector<2xf32>
    %140 = vector.shape_cast %139 : vector<2xf32> to vector<2x1xf32>
    %cst_25 = arith.constant 0.00333333341 : f32
    %141 = vector.broadcast %cst_25 : f32 to vector<2x1xf32>
    %142 = arith.mulf %137, %141 : vector<2x1xf32>
    %cst_26 = arith.constant 0.00333333341 : f32
    %143 = vector.broadcast %cst_26 : f32 to vector<2x1xf32>
    %144 = arith.mulf %140, %143 : vector<2x1xf32>
    %145 = arith.mulf %142, %142 : vector<2x1xf32>
    %146 = arith.subf %144, %145 : vector<2x1xf32>
    %cst_27 = arith.constant 0.000000e+00 : f32
    %147 = vector.broadcast %cst_27 : f32 to vector<2x1xf32>
    %148 = arith.maximumf %146, %147 : vector<2x1xf32>
    %cst_28 = arith.constant 9.99999974E-6 : f32
    %149 = vector.broadcast %cst_28 : f32 to vector<2x1xf32>
    %150 = arith.addf %148, %149 : vector<2x1xf32>
    %151 = math.rsqrt %150 : vector<2x1xf32>
    %152 = vector.broadcast %142 : vector<2x1xf32> to vector<2x300xf32>
    %153 = arith.subf %135, %152 : vector<2x300xf32>
    %154 = vector.broadcast %151 : vector<2x1xf32> to vector<2x300xf32>
    %155 = arith.mulf %153, %154 : vector<2x300xf32>
    %156 = vector.broadcast %0 : vector<1x300xf32> to vector<2x300xf32>
    %157 = arith.mulf %155, %156 : vector<2x300xf32>
    %158 = vector.broadcast %1 : vector<1x300xf32> to vector<2x300xf32>
    %159 = arith.addf %157, %158 : vector<2x300xf32>
    %c0_29 = arith.constant 0 : index
    %c0_30 = arith.constant 0 : index
    %160 = vector.load %arg8[%c0_29, %c0_30] : memref<300x128xf32, #tpu.memory_space<vmem>>, vector<300x128xf32>
    %cst_31 = arith.constant dense<0.000000e+00> : vector<2x128xf32>
    %161 = tpu.matmul %159, %160, %cst_31 {dimension_numbers = #tpu.dot_dimension_numbers<[1], [0], [0], [1], [0, 0, 1, 1], [], []>} : vector<2x300xf32>, vector<300x128xf32>, vector<2x128xf32> -> vector<2x128xf32>
    %162 = vector.broadcast %4 : vector<1x128xf32> to vector<2x128xf32>
    %163 = arith.addf %161, %162 : vector<2x128xf32>
    %cst_32 = arith.constant dense<0xFF800000> : vector<2xf32>
    %164 = vector.multi_reduction <maximumf>, %163, %cst_32 [1] : vector<2x128xf32> to vector<2xf32>
    %165 = vector.shape_cast %164 : vector<2xf32> to vector<2x1xf32>
    %166 = vector.broadcast %165 : vector<2x1xf32> to vector<2x128xf32>
    %167 = arith.subf %163, %166 : vector<2x128xf32>
    %168 = math.exp %167 : vector<2x128xf32>
    %cst_33 = arith.constant dense<0.000000e+00> : vector<2xf32>
    %169 = vector.multi_reduction <add>, %168, %cst_33 [1] : vector<2x128xf32> to vector<2xf32>
    %170 = vector.shape_cast %169 : vector<2xf32> to vector<2x1xf32>
    %171 = tpu.reciprocal %170 {approx = true} : vector<2x1xf32> -> vector<2x1xf32>
    %172 = arith.mulf %170, %171 : vector<2x1xf32>
    %cst_34 = arith.constant 2.000000e+00 : f32
    %173 = vector.broadcast %cst_34 : f32 to vector<2x1xf32>
    %174 = arith.subf %173, %172 : vector<2x1xf32>
    %175 = arith.mulf %171, %174 : vector<2x1xf32>
    %176 = vector.broadcast %175 : vector<2x1xf32> to vector<2x128xf32>
    %177 = arith.mulf %168, %176 : vector<2x128xf32>
    %c0_35 = arith.constant 0 : index
    %c0_36 = arith.constant 0 : index
    %178 = vector.load %arg10[%c0_35, %c0_36] : memref<2x128xf32, #tpu.memory_space<vmem>>, vector<2x128xf32>
    tpu.vector_store %arg10[%c0_35, %c0_36], %177 {strides = array<i32>} : memref<2x128xf32, #tpu.memory_space<vmem>>, vector<2x128xf32>,
    return
  }
  func.func @transform_0(%arg0: i32) -> (i32, i32) {
    %c0_i32 = arith.constant 0 : i32
    %c0_i32_0 = arith.constant 0 : i32
    return %arg0, %c0_i32 : i32, i32
  }
  func.func @transform_1(%arg0: i32) -> (i32, i32) {
    %c0_i32 = arith.constant 0 : i32
    %c0_i32_0 = arith.constant 0 : i32
    %c0_i32_1 = arith.constant 0 : i32
    return %c0_i32, %c0_i32_0 : i32, i32
  }
  func.func @transform_2(%arg0: i32) -> (i32, i32) {
    %c0_i32 = arith.constant 0 : i32
    %c0_i32_0 = arith.constant 0 : i32
    %c0_i32_1 = arith.constant 0 : i32
    return %c0_i32, %c0_i32_0 : i32, i32
  }
  func.func @transform_3(%arg0: i32) -> (i32, i32) {
    %c0_i32 = arith.constant 0 : i32
    %c0_i32_0 = arith.constant 0 : i32
    %c0_i32_1 = arith.constant 0 : i32
    return %c0_i32, %c0_i32_0 : i32, i32
  }
  func.func @transform_4(%arg0: i32) -> (i32, i32) {
    %c0_i32 = arith.constant 0 : i32
    %c0_i32_0 = arith.constant 0 : i32
    %c0_i32_1 = arith.constant 0 : i32
    return %c0_i32, %c0_i32_0 : i32, i32
  }
  func.func @transform_5(%arg0: i32) -> (i32, i32) {
    %c0_i32 = arith.constant 0 : i32
    %c0_i32_0 = arith.constant 0 : i32
    %c0_i32_1 = arith.constant 0 : i32
    return %c0_i32, %c0_i32_0 : i32, i32
  }
  func.func @transform_6(%arg0: i32) -> (i32, i32) {
    %c0_i32 = arith.constant 0 : i32
    %c0_i32_0 = arith.constant 0 : i32
    %c0_i32_1 = arith.constant 0 : i32
    return %c0_i32, %c0_i32_0 : i32, i32
  }
  func.func @transform_7(%arg0: i32) -> (i32, i32) {
    %c0_i32 = arith.constant 0 : i32
    %c0_i32_0 = arith.constant 0 : i32
    %c0_i32_1 = arith.constant 0 : i32
    return %c0_i32, %c0_i32_0 : i32, i32
  }
  func.func @transform_8(%arg0: i32) -> (i32, i32) {
    %c0_i32 = arith.constant 0 : i32
    %c0_i32_0 = arith.constant 0 : i32
    %c0_i32_1 = arith.constant 0 : i32
    return %c0_i32, %c0_i32_0 : i32, i32
  }
  func.func @transform_9(%arg0: i32) -> (i32, i32) {
    %c0_i32 = arith.constant 0 : i32
    %c0_i32_0 = arith.constant 0 : i32
    return %arg0, %c0_i32 : i32, i32
  }
}

</mosaic_0001>

<bundles_post_ra>
// kernel: actor_forward.1
= control target key start
LH: loop header
LB: loop body
LE: loop exit
PB: predicated region body
PF: predicated region fallthrough
CT: control target
= control target key end

     0   :  { %14 = vsyncpa [#allocation3], 0  ;;  %s2377_s0 = inlined_call_operand.vmem [shape: f32[2,16], index: 0, kind: input, shape index: {}]   ;;  %s2378_s1 = inlined_call_operand.hbm [shape: f32[16,300], index: 1, kind: input, shape index: {}]   ;;  %s2379_s2 = inlined_call_operand.vmem [shape: f32[1,300], index: 2, kind: input, shape index: {}]   ;;  %s2380_s3 = inlined_call_operand.vmem [shape: f32[300,300], index: 3, kind: input, shape index: {}]   ;;  %s2381_s4 = inlined_call_operand.vmem [shape: f32[1,300], index: 4, kind: input, shape index: {}]   ;;  %s2382_s5 = inlined_call_operand.vmem [shape: f32[1,300], index: 5, kind: input, shape index: {}]   ;;  %s2383_s6 = inlined_call_operand.vmem [shape: f32[1,300], index: 6, kind: input, shape index: {}]   ;;  %s2384_s7 = inlined_call_operand.vmem [shape: f32[300,128], index: 7, kind: input, shape index: {}]   ;;  %s2385_s8 = inlined_call_operand.vmem [shape: f32[1,128], index: 8, kind: input, shape index: {}]   ;;  %s2386_s9 = inlined_call_operand.hbm [shape: f32[2,128], index: 9, kind: output, shape index: {}]  }
   0x1   :  { %15 = vsyncpa [#allocation4], 0  ;;  %s1571_s30 = smov [#allocation2]   ;;  %s1523_s13 = scalar_lea.hbm %s2378_s1, 768 }
   0x2   :  { %s23_s10 = sshll.u32 %s1571_s30, 4  ;;  %p1524_p0 = scmp.ne.s32.totalorder %s2378_s1, %s1523_s13  ;;  %s24_s10 = int_to_ptr.vmem [resolvable:$true] %s23_s10 }
   0x3   :  { %p1527_p1 = scmp.lt.u32.totalorder %s1523_s13, %s2378_s1 }
   0x5   :  { %p1529_p2 = pnand %p1527_p1, %p1524_p0 }
   0x7   :  { %1532 = shalt.err (!%p1529_p2)
}
   0x8   :  { %s1533_s18 = scalar_lea.vmem %s24_s10, 768  ;;  %p1538_p4 = scmp.lt.s32.totalorder %s24_s10, %s24_s10 }
   0x9   :  { %p1534_p3 = scmp.ne.s32.totalorder %s24_s10, %s1533_s18  ;;  %p1539_p5 = scmp.lt.s32.totalorder %s1533_s18, %s1533_s18 }
   0xb   :  { %p1540_p6 = por %p1539_p5, %p1538_p4 }
   0xd   :  { %p1541_p7 = pnand %p1540_p6, %p1534_p3 }
   0xf   :  { %1544 = shalt.err (!%p1541_p7)
}
  0x10   :  { %s1572_s19 = smov 384   ;;  %s1573_s20 = smov 24  }
  0x11   :  { %29 = dma.hbm_to_vmem [thread:$0]  %s2378_s1, 768, %s24_s10, [#allocation3], %s1572_s19, %s1572_s19, %s1573_s20  }
  0x12   :  { %1567 = dma.done.wait [#allocation3], 768  }
  0x13   :  { %1568 = vsyncadd [#allocation3], 4294966528  ;;  %v1574_v0 = vmov 2   ;;  %v1575_v1 = vmov 0   ;;  %v52_v2 = vld [vmem:[%s2377_s0] sm:$0x3] }
  0x14   :  { %1500 = vset.pattern.permute.xlu1 %v1574_v0  ;;  %1498 = vset.pattern.permute.xlu0 %v1575_v1  ;;  %v1576_v3 = vmov 3   ;;  %v1577_v4 = vmov 1   ;;  %v1578_v5 = vmov 4   ;;  %v1579_v6 = vmov 5   ;;  %v502_v17 = vld [vmem:[%s2380_s3 + $0x8] sm:$0xff]  ;;  %v505_v18 = vld [vmem:[%s2380_s3 + $0x20] sm:$0xff] }
  0x15   :  { %102 = vperm.xlu1 %1500, %v52_v2   ;;  %61 = vperm.xlu0 %1498, %v52_v2   ;;  %v1580_v7 = vmov 6   ;;  %v1581_v8 = vmov 8   ;;  %v1582_v9 = vmov 7   ;;  %v1583_v10 = vmov 11   ;;  %v501_v19 = vld [vmem:[%s2380_s3] sm:$0xff]  ;;  %v504_v21 = vld [vmem:[%s2380_s3 + $0x18] sm:$0xff] }
  0x16   :  { %v1584_v11 = vmov 9   ;;  %v1585_v12 = vmov 14   ;;  %v1586_v13 = vmov 10   ;;  %v1587_v14 = vmov 15   ;;  %v508_v22 = vld [vmem:[%s2380_s3 + $0x38] sm:$0xff]  ;;  %v511_v23 = vld [vmem:[%s2380_s3 + $0x50] sm:$0xff] }
  0x17   :  { %v1588_v15 = vmov 12   ;;  %v1589_v16 = vmov 13   ;;  %v1308_v20 = vpack.c.bf16 %v505_v18, %v502_v17  ;;  %v1310_v24 = vpack.c.bf16 %v504_v21, %v501_v19  ;;  %v507_v26 = vld [vmem:[%s2380_s3 + $0x30] sm:$0xff]  ;;  %v510_v27 = vld [vmem:[%s2380_s3 + $0x48] sm:$0xff]  ;;  %v517_v29 = vld [vmem:[%s2380_s3 + $0x80] sm:$0xff] }
  0x18   :  { %v1312_v25 = vpack.c.bf16 %v511_v23, %v508_v22  ;;  %v514_v28 = vld [vmem:[%s2380_s3 + $0x68] sm:$0xff]  ;;  %v1314_v30 = vpack.c.bf16 %v510_v27, %v507_v26  ;;  %v513_v32 = vld [vmem:[%s2380_s3 + $0x60] sm:$0xff]  ;;  %v516_v33 = vld [vmem:[%s2380_s3 + $0x78] sm:$0xff]  ;;  %v64_v19 = vlaneseq  ;;  %vm431_vm0 = vcmask 1041408  }
  0x19   :  { %1501 = vset.pattern.permute.xlu1 %v1576_v3  ;;  %1499 = vset.pattern.permute.xlu0 %v1577_v4  ;;  %v1316_v31 = vpack.c.bf16 %v517_v29, %v514_v28  ;;  %v520_v34 = vld [vmem:[%s2380_s3 + $0x98] sm:$0xff]  ;;  %v523_v35 = vld [vmem:[%s2380_s3 + $0xb0] sm:$0xff]  ;;  %v1318_v36 = vpack.c.bf16 %v516_v33, %v513_v32  ;;  %v522_v39 = vld [vmem:[%s2380_s3 + $0xa8] sm:$0xff]  ;;  %vm435_vm1 = vcmask 353280   ;;  %vm635_vm2 = vcmask 1043456  }
  0x1a   :  { %124 = vperm.xlu1 %1501, %v52_v2   ;;  %80 = vperm.xlu0 %1499, %v52_v2   ;;  %v1320_v37 = vpack.c.bf16 %v523_v35, %v520_v34  ;;  %v519_v38 = vld [vmem:[%s2380_s3 + $0x90] sm:$0xff]  ;;  %v526_v40 = vld [vmem:[%s2380_s3 + $0xc8] sm:$0xff]  ;;  %v529_v41 = vld [vmem:[%s2380_s3 + $0xe0] sm:$0xff]  ;;  %vm1591_vm3 = vmmov 1   ;;  %vm1593_vm5 = vmmov 0   ;;  %vm631_vm6 = vcmask 359424  }
  0x1b   :  { %1309 = vmatprep.subr.bf16.mxu0 %v1308_v20  ;;  %v551_v42 = vld [vmem:[%s2380_s3 + $0x190] sm:$0xff]  ;;  %v554_v43 = vld [vmem:[%s2380_s3 + $0x1a8] sm:$0xff]  ;;  %v1322_v44 = vpack.c.bf16 %v522_v39, %v519_v38  ;;  %v525_v45 = vld [vmem:[%s2380_s3 + $0xc0] sm:$0xff]  ;;  %v1324_v48 = vpack.c.bf16 %v529_v41, %v526_v40  ;;  %v65_v20 = vshrl.u32 %v64_v19, 7 }
  0x1c   :  { %1311 = vmatpush1.bf16.msra.mxu0 %v1310_v24  ;;  %v1386_v46 = vpack.c.bf16 %v554_v43, %v551_v42  ;;  %v503_v47 = vld [vmem:[%s2380_s3 + $0x10] sm:$0xff]  ;;  %v528_v49 = vld [vmem:[%s2380_s3 + $0xd8] sm:$0xff]  ;;  %v506_v51 = vld [vmem:[%s2380_s3 + $0x28] sm:$0xff] }
  0x1d   :  { %1313 = vmatprep.subr.bf16.mxu0 %v1312_v25  ;;  %v532_v50 = vld [vmem:[%s2380_s3 + $0xf8] sm:$0xff]  ;;  %v535_v52 = vld [vmem:[%s2380_s3 + $0x110] sm:$0xff]  ;;  %v1388_v53 = vpack.c.bf16 %v506_v51, %v503_v47  ;;  %v557_v54 = vld [vmem:[%s2380_s3 + $0x1c0] sm:$0xff]  ;;  %v1326_v57 = vpack.c.bf16 %v528_v49, %v525_v45  ;;  %v1792_v21 = vsub.s32 0, %v65_v20  ;;  %v1794_v22 = vsub.s32 2, %v65_v20 }
  0x1e   :  { %1502 = vset.pattern.permute.xlu1 %v1578_v5  ;;  %1503 = vset.pattern.permute.xlu0 %v1579_v6  ;;  %v560_v55 = vld [vmem:[%s2380_s3 + $0x1d8] sm:$0xff]  ;;  %v1328_v58 = vpack.c.bf16 %v535_v52, %v532_v50  ;;  %v531_v59 = vld [vmem:[%s2380_s3 + $0xf0] sm:$0xff]  ;;  %v534_v60 = vld [vmem:[%s2380_s3 + $0x108] sm:$0xff]  ;;  %v1796_v23 = vsub.s32 1, %v65_v20  ;;  %v1812_v33 = vsub.s32 4, %v65_v20  ;;  %v1828_v41 = vsub.s32 6, %v65_v20 }
  0x1f   :  { %146 = vperm.xlu1 %1502, %v52_v2   ;;  %168 = vperm.xlu0 %1503, %v52_v2   ;;  %v1390_v56 = vpack.c.bf16 %v560_v55, %v557_v54  ;;  %v538_v61 = vld [vmem:[%s2380_s3 + $0x128] sm:$0xff]  ;;  %v541_v62 = vld [vmem:[%s2380_s3 + $0x140] sm:$0xff]  ;;  %v1330_v63 = vpack.c.bf16 %v534_v60, %v531_v59  ;;  %v544_v3 = vld [vmem:[%s2380_s3 + $0x158] sm:$0xff] }
  0x20   :  { %1315 = vmatpush1.bf16.msra.mxu0 %v1314_v30  ;;  %1387 = vmatprep.subr.bf16.mxu1 %v1386_v46  ;;  %v1332_v0 = vpack.c.bf16 %v541_v62, %v538_v61  ;;  %v537_v1 = vld [vmem:[%s2380_s3 + $0x120] sm:$0xff]  ;;  %v547_v4 = vld [vmem:[%s2380_s3 + $0x170] sm:$0xff]  ;;  %v1800_v25 = vld [vmem:[#allocation2 + $0x8] sm:$0xff]  ;;  %v1806_v30 = vsub.s32 3, %v65_v20 }
  0x21   :  { %1317 = vmatprep.subr.bf16.mxu0 %v1316_v31  ;;  %1389 = vmatpush3.bf16.msra.mxu1 %v1388_v53  ;;  %v1336_v6 = vpack.c.bf16 %v547_v4, %v544_v3  ;;  %v1798_v24 = vld [vmem:[#allocation2] sm:$0xff]  ;;  %v1802_v26 = vld [vmem:[#allocation2 + $0x10] sm:$0xff]  ;;  %v71_v31 = vrot.slane %v1800_v25, %v1792_v21  ;;  %v112_v35 = vrot.slane %v1800_v25, %v1794_v22  ;;  %vm2184_vm4 = vmpackc.low %vm635_vm2, %vm1591_vm3 }
  0x22   :  { %1391 = vmatprep.subr.bf16.mxu1 %v1390_v56  ;;  %v67_v28 = vrot.slane %v1798_v24, %v1792_v21  ;;  %v75_v32 = vrot.slane %v1802_v26, %v1792_v21  ;;  %v108_v34 = vrot.slane %v1798_v24, %v1794_v22  ;;  %v116_v38 = vrot.slane %v1802_v26, %v1794_v22 }
  0x23   :  { %1504 = vset.pattern.permute.xlu1 %v1580_v7  ;;  %1506 = vset.pattern.permute.xlu0 %v1581_v8  ;;  %v543_v7 = vld [vmem:[%s2380_s3 + $0x150] sm:$0xff]  ;;  %v546_v8 = vld [vmem:[%s2380_s3 + $0x168] sm:$0xff]  ;;  %v90_v39 = vrot.slane %v1800_v25, %v1796_v23  ;;  %v94_v40 = vrot.slane %v1802_v26, %v1796_v23  ;;  %v130_v43 = vrot.slane %v1798_v24, %v1806_v30 }
  0x24   :  { %190 = vperm.xlu1 %1504, %v52_v2   ;;  %234 = vperm.xlu0 %1506, %v52_v2   ;;  %v138_v45 = vrot.slane %v1802_v26, %v1806_v30  ;;  %v152_v50 = vrot.slane %v1798_v24, %v1812_v33  ;;  %v156_v51 = vrot.slane %v1800_v25, %v1812_v33 }
  0x25   :  { %1319 = vmatpush1.bf16.msra.mxu0 %v1318_v36  ;;  %v86_v36 = vrot.slane %v1798_v24, %v1796_v23  ;;  %v160_v53 = vrot.slane %v1802_v26, %v1812_v33  ;;  %v196_v59 = vrot.slane %v1798_v24, %v1828_v41  ;;  %v200_v62 = vrot.slane %v1800_v25, %v1828_v41 }
  0x26   :  { %1321 = vmatprep.subr.bf16.mxu0 %v1320_v37  ;;  %v1820_v37 = vsub.s32 5, %v65_v20 }
  0x28   :  { %1505 = vset.pattern.permute.xlu1 %v1582_v9  ;;  %1509 = vset.pattern.permute.xlu0 %v1583_v10  ;;  %v550_v9 = vld [vmem:[%s2380_s3 + $0x188] sm:$0xff]  ;;  %v553_v10 = vld [vmem:[%s2380_s3 + $0x1a0] sm:$0xff]  ;;  %v174_v54 = vrot.slane %v1798_v24, %v1820_v37  ;;  %v178_v55 = vrot.slane %v1800_v25, %v1820_v37 }
  0x29   :  { %212 = vperm.xlu1 %1505, %v52_v2   ;;  %300 = vperm.xlu0 %1509, %v52_v2  }
  0x2a   :  { %1323 = vmatpush1.bf16.msra.mxu0 %v1322_v44  ;;  %v134_v44 = vrot.slane %v1800_v25, %v1806_v30 }
  0x2b   :  { %1325 = vmatprep.subr.bf16.mxu0 %v1324_v48 }
  0x2d   :  { %1507 = vset.pattern.permute.xlu1 %v1584_v11  ;;  %1512 = vset.pattern.permute.xlu0 %v1585_v12  ;;  %v1338_v11 = vpack.c.bf16 %v546_v8, %v543_v7  ;;  %v1340_v12 = vpack.c.bf16 %v553_v10, %v550_v9 }
  0x2e   :  { %256 = vperm.xlu1 %1507, %v52_v2   ;;  %366 = vperm.xlu0 %1512, %v52_v2  }
  0x2f   :  { %1327 = vmatpush1.bf16.msra.mxu0 %v1326_v57 }
  0x30   :  { %1329 = vmatprep.subr.bf16.mxu0 %v1328_v58  ;;  %v182_v58 = vrot.slane %v1802_v26, %v1820_v37 }
  0x32   :  { %1508 = vset.pattern.permute.xlu1 %v1586_v13  ;;  %1514 = vset.pattern.permute.xlu0 %v1587_v14  ;;  %v549_v13 = vld [vmem:[%s2380_s3 + $0x180] sm:$0xff] }
  0x33   :  { %278 = vperm.xlu1 %1508, %v52_v2   ;;  %1331 = vmatpush1.bf16.msra.mxu0 %v1330_v63  ;;  %v1852_v63 = vsub.s32 7, %v65_v20 }
  0x34   :  { %1333 = vmatprep.subr.bf16.mxu0 %v1332_v0 }
  0x37   :  { %1510 = vset.pattern.permute.xlu1 %v1588_v15  ;;  %v556_v15 = vld [vmem:[%s2380_s3 + $0x1b8] sm:$0xff] }
  0x38   :  { %322 = vperm.xlu1 %1510, %v52_v2  }
  0x3c   :  { %1511 = vset.pattern.permute.xlu1 %v1589_v16  ;;  %v559_v16 = vld [vmem:[%s2380_s3 + $0x1d0] sm:$0xff] }
  0x3d   :  { %344 = vperm.xlu1 %1511, %v52_v2   ;;  %v1344_v18 = vpack.c.bf16 %v559_v16, %v556_v15 }
  0x41   :  { %1513 = vset.pattern.permute.xlu1 %v1587_v14  ;;  %v552_v14 = vld [vmem:[%s2380_s3 + $0x198] sm:$0xff] }
  0x42   :  { %388 = vperm.xlu1 %1513, %v52_v2   ;;  %v540_v2 = vld [vmem:[%s2380_s3 + $0x138] sm:$0xff]  ;;  %v1342_v17 = vpack.c.bf16 %v552_v14, %v549_v13 }
  0x43   :  { %v1334_v5 = vpack.c.bf16 %v540_v2, %v537_v1 }
  0x45   :  { %1335 = vmatpush1.bf16.msra.mxu0 %v1334_v5 }
  0x46   :  { %1337 = vmatprep.subr.bf16.mxu0 %v1336_v6 }
  0x49   :  { %1339 = vmatpush1.bf16.msra.mxu0 %v1338_v11 }
  0x4a   :  { %1341 = vmatprep.subr.bf16.mxu0 %v1340_v12 }
  0x4d   :  { %1343 = vmatpush1.bf16.msra.mxu0 %v1342_v17  ;;  %v204_v17 = vrot.slane %v1802_v26, %v1828_v41 }
  0x4e   :  { %1345 = vmatprep.subr.bf16.mxu0 %v1344_v18 }
  0x94   :  { %v103_v27 = vpop.permute.xlu1 %102  ;;  %v62_v29 = vpop.permute.xlu0 %61 }
  0x95   :  { %v76_v42 = vmul.f32 %v67_v28, %v62_v29  ;;  %v77_v46 = vmul.f32 %v71_v31, %v62_v29  ;;  %v78_v47 = vmul.f32 %v75_v32, %v62_v29  ;;  %v117_v60 = vmul.f32 %v108_v34, %v103_v27 }
  0x96   :  { %v118_v0 = vmul.f32 %v112_v35, %v103_v27  ;;  %v119_v1 = vmul.f32 %v116_v38, %v103_v27  ;;  %v218_v34 = vrot.slane %v1798_v24, %v1852_v63  ;;  %v1858_v35 = vld [vmem:[#allocation2 + $0x18] sm:$0xff] }
  0x97   :  { %v240_v24 = vrot.slane %v1858_v35, %v1792_v21 }
  0x99   :  { %v125_v48 = vpop.permute.xlu1 %124  ;;  %v81_v49 = vpop.permute.xlu0 %80 }
  0x9a   :  { %v95_v52 = vmul.f32 %v86_v36, %v81_v49  ;;  %v96_v56 = vmul.f32 %v90_v39, %v81_v49  ;;  %v97_v57 = vmul.f32 %v94_v40, %v81_v49  ;;  %v139_v4 = vmul.f32 %v130_v43, %v125_v48  ;;  %v1860_v36 = vld [vmem:[#allocation2 + $0x20] sm:$0xff]  ;;  %v1864_v43 = vld [vmem:[#allocation2 + $0x28] sm:$0xff] }
  0x9b   :  { %v140_v5 = vmul.f32 %v134_v44, %v125_v48  ;;  %v141_v6 = vmul.f32 %v138_v45, %v125_v48  ;;  %v244_v48 = vrot.slane %v1860_v36, %v1792_v21  ;;  %v248_v49 = vrot.slane %v1864_v43, %v1792_v21 }
  0x9c   :  { %v98_v61 = vadd.f32 %v95_v52, %v76_v42  ;;  %v99_v2 = vadd.f32 %v96_v56, %v77_v46  ;;  %v100_v3 = vadd.f32 %v97_v57, %v78_v47  ;;  %v222_v42 = vrot.slane %v1800_v25, %v1852_v63 }
  0x9d   :  { %v226_v47 = vrot.slane %v1802_v26, %v1852_v63 }
  0x9e   :  { %v120_v7 = vadd.f32 %v117_v60, %v98_v61  ;;  %v147_v8 = vpop.permute.xlu1 %146  ;;  %v169_v9 = vpop.permute.xlu0 %168  ;;  %v121_v10 = vadd.f32 %v118_v0, %v99_v2  ;;  %v122_v11 = vadd.f32 %v119_v1, %v100_v3  ;;  %v270_v60 = vrot.slane %v1864_v43, %v1796_v23 }
  0x9f   :  { %v161_v12 = vmul.f32 %v152_v50, %v147_v8  ;;  %v162_v13 = vmul.f32 %v156_v51, %v147_v8  ;;  %v163_v15 = vmul.f32 %v160_v53, %v147_v8  ;;  %v183_v16 = vmul.f32 %v174_v54, %v169_v9 }
  0xa0   :  { %v142_v14 = vadd.f32 %v139_v4, %v120_v7  ;;  %v143_v18 = vadd.f32 %v140_v5, %v121_v10  ;;  %v144_v19 = vadd.f32 %v141_v6, %v122_v11  ;;  %v184_v20 = vmul.f32 %v178_v55, %v169_v9 }
  0xa1   :  { %v185_v27 = vmul.f32 %v182_v58, %v169_v9  ;;  %v262_v53 = vrot.slane %v1858_v35, %v1796_v23  ;;  %v284_v3 = vrot.slane %v1858_v35, %v1794_v22  ;;  %v288_v10 = vrot.slane %v1860_v36, %v1794_v22 }
  0xa2   :  { %v164_v28 = vadd.f32 %v161_v12, %v142_v14  ;;  %v165_v29 = vadd.f32 %v162_v13, %v143_v18  ;;  %v166_v31 = vadd.f32 %v163_v15, %v144_v19  ;;  %v292_v11 = vrot.slane %v1864_v43, %v1794_v22 }
  0xa3   :  { %v191_v32 = vpop.permute.xlu1 %190  ;;  %v235_v50 = vpop.permute.xlu0 %234  ;;  %v306_v12 = vrot.slane %v1858_v35, %v1806_v30  ;;  %v310_v13 = vrot.slane %v1860_v36, %v1806_v30  ;;  %v314_v14 = vrot.slane %v1864_v43, %v1806_v30  ;;  %v328_v19 = vrot.slane %v1858_v35, %v1812_v33 }
  0xa4   :  { %v186_v38 = vadd.f32 %v183_v16, %v164_v28  ;;  %v205_v39 = vmul.f32 %v196_v59, %v191_v32  ;;  %v206_v40 = vmul.f32 %v200_v62, %v191_v32  ;;  %v187_v44 = vadd.f32 %v184_v20, %v165_v29 }
  0xa5   :  { %v188_v45 = vadd.f32 %v185_v27, %v166_v31  ;;  %v207_v46 = vmul.f32 %v204_v17, %v191_v32  ;;  %v249_v57 = vmul.f32 %v240_v24, %v235_v50  ;;  %v250_v58 = vmul.f32 %v244_v48, %v235_v50 }
  0xa6   :  { %v208_v51 = vadd.f32 %v205_v39, %v186_v38  ;;  %v209_v25 = vadd.f32 %v206_v40, %v187_v44  ;;  %v266_v59 = vrot.slane %v1860_v36, %v1796_v23  ;;  %v251_v1 = vmul.f32 %v248_v49, %v235_v50 }
  0xa7   :  { %v210_v54 = vadd.f32 %v207_v46, %v188_v45  ;;  %v336_v38 = vrot.slane %v1864_v43, %v1812_v33  ;;  %v350_v45 = vrot.slane %v1858_v35, %v1820_v37  ;;  %v372_v46 = vrot.slane %v1858_v35, %v1828_v41 }
  0xa8   :  { %v213_v52 = vpop.permute.xlu1 %212  ;;  %v301_v15 = vpop.permute.xlu0 %300  ;;  %v380_v24 = vrot.slane %v1864_v43, %v1828_v41 }
  0xa9   :  { %v227_v55 = vmul.f32 %v218_v34, %v213_v52  ;;  %v228_v56 = vmul.f32 %v222_v42, %v213_v52  ;;  %v229_v26 = vmul.f32 %v226_v47, %v213_v52  ;;  %v315_v31 = vmul.f32 %v306_v12, %v301_v15 }
  0xaa   :  { %v316_v32 = vmul.f32 %v310_v13, %v301_v15  ;;  %v332_v34 = vrot.slane %v1860_v36, %v1812_v33  ;;  %v317_v42 = vmul.f32 %v314_v14, %v301_v15  ;;  %v376_v47 = vrot.slane %v1860_v36, %v1828_v41 }
  0xab   :  { %v230_v61 = vadd.f32 %v227_v55, %v208_v51  ;;  %v231_v62 = vadd.f32 %v228_v56, %v209_v25  ;;  %v232_v0 = vadd.f32 %v229_v26, %v210_v54  ;;  %v358_v54 = vrot.slane %v1864_v43, %v1820_v37 }
  0xad   :  { %v257_v2 = vpop.permute.xlu1 %256  ;;  %v252_v4 = vadd.f32 %v249_v57, %v230_v61  ;;  %v253_v5 = vadd.f32 %v250_v58, %v231_v62  ;;  %v254_v8 = vadd.f32 %v251_v1, %v232_v0  ;;  %v367_v51 = vpop.permute.xlu0 %366  ;;  %v49_v0 = vld [vmem:[%s2379_s2] sm:$0x7]  ;;  %v394_v1 = vrot.slane %v1858_v35, %v1852_v63 }
  0xae   :  { %v271_v6 = vmul.f32 %v262_v53, %v257_v2  ;;  %v272_v7 = vmul.f32 %v266_v59, %v257_v2  ;;  %v273_v9 = vmul.f32 %v270_v60, %v257_v2  ;;  %v354_v53 = vrot.slane %v1860_v36, %v1820_v37 }
  0xaf   :  { %v381_v55 = vmul.f32 %v372_v46, %v367_v51  ;;  %v382_v58 = vmul.f32 %v376_v47, %v367_v51  ;;  %v383_v59 = vmul.f32 %v380_v24, %v367_v51  ;;  %v398_v37 = vrot.slane %v1860_v36, %v1852_v63  ;;  %v555_v46 = vld [vmem:[%s2380_s3 + $0x1b0] sm:$0xff]  ;;  %v558_v47 = vld [vmem:[%s2380_s3 + $0x1c8] sm:$0xff]  ;;  %v509_v24 = vld [vmem:[%s2380_s3 + $0x40] sm:$0xff] }
  0xb0   :  { %v274_v16 = vadd.f32 %v271_v6, %v252_v4  ;;  %v275_v17 = vadd.f32 %v272_v7, %v253_v5  ;;  %v276_v20 = vadd.f32 %v273_v9, %v254_v8  ;;  %v402_v2 = vrot.slane %v1864_v43, %v1852_v63  ;;  %v565_v51 = vld [vmem:[%s2380_s3 + $0x200] sm:$0xff] }
  0xb1   :  { %v413_v6 = vrot.slane %v49_v0, %v1792_v21  ;;  %v421_v14 = vrot.slane %v49_v0, %v1794_v22 }
  0xb2   :  { %v279_v18 = vpop.permute.xlu1 %278 }
  0xb3   :  { %v293_v27 = vmul.f32 %v284_v3, %v279_v18  ;;  %v294_v28 = vmul.f32 %v288_v10, %v279_v18  ;;  %v295_v29 = vmul.f32 %v292_v11, %v279_v18  ;;  %v417_v11 = vrot.slane %v49_v0, %v1796_v23  ;;  %v572_v0 = vld [vmem:[%s2380_s3 + $0x238] sm:$0xff] }
  0xb5   :  { %v296_v30 = vadd.f32 %v293_v27, %v274_v16  ;;  %v297_v39 = vadd.f32 %v294_v28, %v275_v17  ;;  %v298_v40 = vadd.f32 %v295_v29, %v276_v20 }
  0xb7   :  { %v323_v44 = vpop.permute.xlu1 %322  ;;  %v318_v48 = vadd.f32 %v315_v31, %v296_v30  ;;  %v319_v49 = vadd.f32 %v316_v32, %v297_v39  ;;  %v320_v25 = vadd.f32 %v317_v42, %v298_v40 }
  0xb8   :  { %v337_v33 = vmul.f32 %v328_v19, %v323_v44  ;;  %v338_v50 = vmul.f32 %v332_v34, %v323_v44  ;;  %v339_v52 = vmul.f32 %v336_v38, %v323_v44 }
  0xba   :  { %v340_v56 = vadd.f32 %v337_v33, %v318_v48  ;;  %v341_v26 = vadd.f32 %v338_v50, %v319_v49  ;;  %v342_v41 = vadd.f32 %v339_v52, %v320_v25  ;;  %v1346_v48 = vpack.c.bf16 %v558_v47, %v555_v46  ;;  %v512_v49 = vld [vmem:[%s2380_s3 + $0x58] sm:$0xff]  ;;  %v562_v50 = vld [vmem:[%s2380_s3 + $0x1e8] sm:$0xff]  ;;  %v563_v25 = vld [vmem:[%s2380_s3 + $0x1f0] sm:$0xff] }
  0xbb   :  { %v1392_v33 = vpack.c.bf16 %v512_v49, %v509_v24  ;;  %v1348_v52 = vpack.c.bf16 %v565_v51, %v562_v50  ;;  %v590_v46 = vld [vmem:[%s2380_s3 + $0x2c8] sm:$0xff]  ;;  %v585_v47 = vld [vmem:[%s2380_s3 + $0x2a0] sm:$0xff]  ;;  %v539_v49 = vld [vmem:[%s2380_s3 + $0x130] sm:$0xff] }
  0xbc   :  { %v345_v57 = vpop.permute.xlu1 %344  ;;  %1347 = vmatpush1.bf16.msra.mxu0 %v1346_v48  ;;  %v588_v48 = vld [vmem:[%s2380_s3 + $0x2b8] sm:$0xff] }
  0xbd   :  { %v359_v60 = vmul.f32 %v350_v45, %v345_v57  ;;  %v360_v61 = vmul.f32 %v354_v53, %v345_v57  ;;  %v361_v62 = vmul.f32 %v358_v54, %v345_v57  ;;  %1393 = vmatpush3.bf16.msra.mxu1 %v1392_v33  ;;  %v566_v53 = vld [vmem:[%s2380_s3 + $0x208] sm:$0xff]  ;;  %v561_v54 = vld [vmem:[%s2380_s3 + $0x1e0] sm:$0xff]  ;;  %v515_v57 = vld [vmem:[%s2380_s3 + $0x70] sm:$0xff]  ;;  %1349 = vmatprep.subr.bf16.mxu0 %v1348_v52 }
  0xbe   :  { %v542_v33 = vld [vmem:[%s2380_s3 + $0x148] sm:$0xff]  ;;  %v1366_v50 = vpack.c.bf16 %v588_v48, %v585_v47  ;;  %v592_v51 = vld [vmem:[%s2380_s3 + $0x2d8] sm:$0xff]  ;;  %v593_v52 = vld [vmem:[%s2380_s3 + $0x2e0] sm:$0xff] }
  0xbf   :  { %v362_v3 = vadd.f32 %v359_v60, %v340_v56  ;;  %v363_v4 = vadd.f32 %v360_v61, %v341_v26  ;;  %v364_v5 = vadd.f32 %v361_v62, %v342_v41  ;;  %v1394_v56 = vpack.c.bf16 %v566_v53, %v563_v25  ;;  %v568_v41 = vld [vmem:[%s2380_s3 + $0x218] sm:$0xff]  ;;  %v571_v60 = vld [vmem:[%s2380_s3 + $0x230] sm:$0xff]  ;;  %v569_v61 = vld [vmem:[%s2380_s3 + $0x220] sm:$0xff] }
  0xc0   :  { %v1352_v62 = vpack.c.bf16 %v571_v60, %v568_v41  ;;  %v595_v25 = vld [vmem:[%s2380_s3 + $0x2f0] sm:$0xff]  ;;  %v1412_v53 = vpack.c.bf16 %v542_v33, %v539_v49  ;;  %v613_v47 = vld [vmem:[%s2380_s3 + $0x380] sm:$0xf] }
  0xc1   :  { %v384_v7 = vadd.f32 %v381_v55, %v362_v3  ;;  %v385_v8 = vadd.f32 %v382_v58, %v363_v4  ;;  %v386_v9 = vadd.f32 %v383_v59, %v364_v5  ;;  %v389_v10 = vpop.permute.xlu1 %388  ;;  %v564_v55 = vld [vmem:[%s2380_s3 + $0x1f8] sm:$0xff]  ;;  %v518_v58 = vld [vmem:[%s2380_s3 + $0x88] sm:$0xff]  ;;  %1395 = vmatprep.subr.bf16.mxu1 %v1394_v56  ;;  %v521_v4 = vld [vmem:[%s2380_s3 + $0xa0] sm:$0xff] }
  0xc2   :  { %v403_v12 = vmul.f32 %v394_v1, %v389_v10  ;;  %v404_v13 = vmul.f32 %v398_v37, %v389_v10  ;;  %v405_v35 = vmul.f32 %v402_v2, %v389_v10  ;;  %v1350_v26 = vpack.c.bf16 %v564_v55, %v561_v54  ;;  %v567_v1 = vld [vmem:[%s2380_s3 + $0x210] sm:$0xff]  ;;  %v570_v37 = vld [vmem:[%s2380_s3 + $0x228] sm:$0xff]  ;;  %v524_v5 = vld [vmem:[%s2380_s3 + $0xb8] sm:$0xff] }
  0xc3   :  { %v1396_v59 = vpack.c.bf16 %v518_v58, %v515_v57  ;;  %v1398_v2 = vpack.c.bf16 %v572_v0, %v569_v61  ;;  %v1354_v3 = vpack.c.bf16 %v570_v37, %v567_v1  ;;  %v1368_v54 = vpack.c.bf16 %v595_v25, %v592_v51  ;;  %v596_v55 = vld [vmem:[%s2380_s3 + $0x2f8] sm:$0xff]  ;;  %v591_v56 = vld [vmem:[%s2380_s3 + $0x2d0] sm:$0xff]  ;;  %v545_v58 = vld [vmem:[%s2380_s3 + $0x160] sm:$0xff] }
  0xc4   :  { %v406_v36 = vadd.f32 %v403_v12, %v384_v7  ;;  %v407_v15 = vadd.f32 %v404_v13, %v385_v8  ;;  %v408_v16 = vadd.f32 %v405_v35, %v386_v9  ;;  %1351 = vmatpush1.bf16.msra.mxu0 %v1350_v26  ;;  %v574_v7 = vld [vmem:[%s2380_s3 + $0x248] sm:$0xff]  ;;  %v577_v8 = vld [vmem:[%s2380_s3 + $0x260] sm:$0xff]  ;;  %v575_v9 = vld [vmem:[%s2380_s3 + $0x250] sm:$0xff]  ;;  %v1414_v57 = vpack.c.bf16 %v596_v55, %v593_v52 }
  0xc5   :  { %1397 = vmatpush3.bf16.msra.mxu1 %v1396_v59  ;;  %1353 = vmatprep.subr.bf16.mxu0 %v1352_v62  ;;  %v1356_v10 = vpack.c.bf16 %v577_v8, %v574_v7  ;;  %v573_v12 = vld [vmem:[%s2380_s3 + $0x240] sm:$0xff]  ;;  %v576_v13 = vld [vmem:[%s2380_s3 + $0x258] sm:$0xff]  ;;  %v594_v26 = vld [vmem:[%s2380_s3 + $0x2e8] sm:$0xff]  ;;  %v1590_v1 = vmov 0.0|0.0   ;;  %v1592_v55 = vmov 0.0  }
  0xc6   :  { %v425_v63 = vadd.f32 %v413_v6, %v406_v36  ;;  %v426_v43 = vadd.f32 %v417_v11, %v407_v15  ;;  %v427_v17 = vadd.f32 %v421_v14, %v408_v16  ;;  %v1400_v6 = vpack.c.bf16 %v524_v5, %v521_v4  ;;  %1399 = vmatprep.subr.bf16.mxu1 %v1398_v2  ;;  %v578_v11 = vld [vmem:[%s2380_s3 + $0x268] sm:$0xff]  ;;  %v527_v36 = vld [vmem:[%s2380_s3 + $0xd0] sm:$0xff]  ;;  %v580_v16 = vld [vmem:[%s2380_s3 + $0x278] sm:$0xff] }
  0xc7   :  { %v1402_v35 = vpack.c.bf16 %v578_v11, %v575_v9  ;;  %v1358_v14 = vpack.c.bf16 %v576_v13, %v573_v12  ;;  %v530_v15 = vld [vmem:[%s2380_s3 + $0xe8] sm:$0xff]  ;;  %v548_v59 = vld [vmem:[%s2380_s3 + $0x178] sm:$0xff]  ;;  %v1370_v41 = vpack.c.bf16 %v594_v26, %v591_v56  ;;  %v601_v62 = vld [vmem:[%s2380_s3 + $0x320] sm:$0xff] }
  0xc8   :  { %v1922_v18 = vmax.f32 %v425_v63, 0.0  ;;  %v1924_v19 = vmax.f32 %v426_v43, 0.0  ;;  %v1926_v20 = vmax.f32 %v427_v17, 0.0  ;;  %1355 = vmatpush1.bf16.msra.mxu0 %v1354_v3  ;;  %v1404_v63 = vpack.c.bf16 %v530_v15, %v527_v36  ;;  %v583_v43 = vld [vmem:[%s2380_s3 + $0x290] sm:$0xff]  ;;  %v581_v17 = vld [vmem:[%s2380_s3 + $0x280] sm:$0xff]  ;;  %v598_v61 = vld [vmem:[%s2380_s3 + $0x308] sm:$0xff] }
  0xc9   :  { %1401 = vmatpush3.bf16.msra.mxu1 %v1400_v6  ;;  %1357 = vmatprep.subr.bf16.mxu0 %v1356_v10  ;;  %v1416_v60 = vpack.c.bf16 %v548_v59, %v545_v58  ;;  %v1372_v0 = vpack.c.bf16 %v601_v62, %v598_v61  ;;  %v47_v9 = vld [vmem:[%s2382_s5] sm:$0x7]  ;;  %v611_v52 = vld [vmem:[%s2380_s3 + $0x370] sm:$0xff] }
  0xca   :  { %v432_v27 = vsel %vm431_vm0, %v1922_v18, 0.0  ;;  %v433_v28 = vsel %vm431_vm0, %v1924_v19, 0.0  ;;  %v440_v29 = vmul.f32 %v1922_v18, %v1922_v18  ;;  %v441_v32 = vmul.f32 %v1924_v19, %v1924_v19  ;;  %1403 = vmatprep.subr.bf16.mxu1 %v1402_v35  ;;  %v48_v10 = vld [vmem:[%s2383_s6] sm:$0x7] }
  0xcb   :  { %v434_v31 = vadd.f32 %v433_v28, %v432_v27  ;;  %v442_v34 = vmul.f32 %v1926_v20, %v1926_v20  ;;  %v436_v38 = vsel %vm435_vm1, %v1926_v20, 0.0  ;;  %v584_v27 = vld [vmem:[%s2380_s3 + $0x298] sm:$0xff]  ;;  %v1360_v28 = vpack.c.bf16 %v583_v43, %v580_v16  ;;  %v599_v43 = vld [vmem:[%s2380_s3 + $0x310] sm:$0xff]  ;;  %v609_v33 = vld [vmem:[%s2380_s3 + $0x360] sm:$0xff] }
  0xcc   :  { %v443_v30 = vsel %vm431_vm0, %v440_v29, 0.0  ;;  %v444_v40 = vsel %vm431_vm0, %v441_v32, 0.0  ;;  %1359 = vmatpush1.bf16.msra.mxu0 %v1358_v14  ;;  %v1406_v29 = vpack.c.bf16 %v584_v27, %v581_v17  ;;  %v582_v32 = vld [vmem:[%s2380_s3 + $0x288] sm:$0xff]  ;;  %v2115_v13 = vrot.slane %v47_v9, %v1796_v23  ;;  %v966_v61 = vld [vmem:[%s2384_s7] sm:$0xff] }
  0xcd   :  { %v437_v39 = vadd.f32 %v436_v38, %v434_v31  ;;  %v445_v42 = vadd.f32 %v444_v40, %v443_v30  ;;  %v446_v44 = vsel %vm435_vm1, %v442_v34, 0.0  ;;  %v579_v31 = vld [vmem:[%s2380_s3 + $0x270] sm:$0xff]  ;;  %v533_v34 = vld [vmem:[%s2380_s3 + $0x100] sm:$0xff]  ;;  %1405 = vmatpush3.bf16.msra.mxu1 %v1404_v63  ;;  %v536_v30 = vld [vmem:[%s2380_s3 + $0x118] sm:$0xff]  ;;  %1361 = vmatprep.subr.bf16.mxu0 %v1360_v28  ;;  %v2118_v35 = vrot.slane %v47_v9, %v1792_v21 }
  0xce   :  { %v1362_v38 = vpack.c.bf16 %v582_v32, %v579_v31  ;;  %v589_v40 = vld [vmem:[%s2380_s3 + $0x2c0] sm:$0xff]  ;;  %1407 = vmatprep.subr.bf16.mxu1 %v1406_v29  ;;  %v2121_v15 = vrot.slane %v48_v10, %v1796_v23  ;;  %v2124_v63 = vrot.slane %v48_v10, %v1792_v21  ;;  %v602_v17 = vld [vmem:[%s2380_s3 + $0x328] sm:$0xff]  ;;  %v604_v29 = vld [vmem:[%s2380_s3 + $0x338] sm:$0xff]  ;;  %v2171_v51 = vrot.slane %v47_v9, %v1794_v22 }
  0xcf   :  { %438 = vadd.xlane.f32.xlu1 %v437_v39  ;;  %v447_v45 = vadd.f32 %v446_v44, %v445_v42  ;;  %v586_v39 = vld [vmem:[%s2380_s3 + $0x2a8] sm:$0xff]  ;;  %v1408_v42 = vpack.c.bf16 %v536_v30, %v533_v34  ;;  %v607_v31 = vld [vmem:[%s2380_s3 + $0x350] sm:$0xff]  ;;  %v1419_v30 = vpack.c.bf16 %v602_v17, %v599_v43  ;;  %v2191_v58 = vrot.slane %v48_v10, %v1794_v22 }
  0xd0   :  { %v1364_v44 = vpack.c.bf16 %v589_v40, %v586_v39  ;;  %1363 = vmatpush1.bf16.msra.mxu0 %v1362_v38  ;;  %v603_v39 = vld [vmem:[%s2380_s3 + $0x330] sm:$0xff]  ;;  %v1376_v40 = vpack.c.bf16 %v607_v31, %v604_v29 }
  0xd1   :  { %448 = vadd.xlane.f32.xlu0 %v447_v45  ;;  %v587_v45 = vld [vmem:[%s2380_s3 + $0x2b0] sm:$0xff]  ;;  %1409 = vmatpush3.bf16.msra.mxu1 %v1408_v42  ;;  %v606_v42 = vld [vmem:[%s2380_s3 + $0x348] sm:$0xff] }
  0xd2   :  { %v1410_v24 = vpack.c.bf16 %v590_v46, %v587_v45  ;;  %1365 = vmatprep.subr.bf16.mxu0 %v1364_v44  ;;  %v605_v44 = vld [vmem:[%s2380_s3 + $0x340] sm:$0xff]  ;;  %v608_v45 = vld [vmem:[%s2380_s3 + $0x358] sm:$0xff]  ;;  %v610_v46 = vld [vmem:[%s2380_s3 + $0x368] sm:$0xff]  ;;  %v1378_v48 = vpack.c.bf16 %v606_v42, %v603_v39 }
  0xd3   :  { %v1422_v49 = vpack.c.bf16 %v608_v45, %v605_v44  ;;  %v1380_v25 = vpack.c.bf16 %v613_v47, %v610_v46  ;;  %v984_v42 = vld [vmem:[%s2384_s7 + $0x90] sm:$0xff]  ;;  %v985_v44 = vld [vmem:[%s2384_s7 + $0x98] sm:$0xff] }
  0xd4   :  { %1411 = vmatprep.subr.bf16.mxu1 %v1410_v24  ;;  %1367 = vmatpush1.bf16.msra.mxu0 %v1366_v50  ;;  %v1432_v45 = vpack.c.bf16 %v985_v44, %v984_v42  ;;  %v968_v46 = vld [vmem:[%s2384_s7 + $0x10] sm:$0xff]  ;;  %v969_v47 = vld [vmem:[%s2384_s7 + $0x18] sm:$0xff] }
  0xd5   :  { %1413 = vmatpush3.bf16.msra.mxu1 %v1412_v53  ;;  %1369 = vmatprep.subr.bf16.mxu0 %v1368_v54  ;;  %v614_v53 = vld [vmem:[%s2380_s3 + $0x388] sm:$0xf] }
  0xd6   :  { %1415 = vmatprep.subr.bf16.mxu1 %v1414_v57  ;;  %v1425_v26 = vpack.c.bf16 %v614_v53, %v611_v52  ;;  %v988_v52 = vld [vmem:[%s2384_s7 + $0xb0] sm:$0xff]  ;;  %v989_v53 = vld [vmem:[%s2384_s7 + $0xb8] sm:$0xff] }
  0xd8   :  { %1371 = vmatpush1.bf16.msra.mxu0 %v1370_v41  ;;  %v982_v41 = vld [vmem:[%s2384_s7 + $0x80] sm:$0xff] }
  0xd9   :  { %1417 = vmatpush3.bf16.msra.mxu1 %v1416_v60  ;;  %1373 = vmatprep.subr.bf16.mxu0 %v1372_v0  ;;  %v983_v60 = vld [vmem:[%s2384_s7 + $0x88] sm:$0xff] }
  0xda   :  { %1418 = vmatprep.subr.bf16.mxu1 %v1590_v1  ;;  %v1428_v62 = vpack.c.bf16 %v983_v60, %v982_v41  ;;  %v967_v0 = vld [vmem:[%s2384_s7 + $0x8] sm:$0xff] }
  0xdb   :  { %v991_v41 = vld [vmem:[%s2384_s7 + $0xc8] sm:$0xff] }
 0x15c   :  { %v439_v37 = vpop.xlane.xlu1 %438 }
 0x15d   :  { %v450_v2 = vmul.f32 0.0033333334, %v439_v37  ;;  %v1430_v37 = vpack.c.bf16 %v967_v0, %v966_v61  ;;  %v974_v61 = vld [vmem:[%s2384_s7 + $0x40] sm:$0xff]  ;;  %v992_v0 = vld [vmem:[%s2384_s7 + $0xd0] sm:$0xff] }
 0x15e   :  { %v449_v3 = vpop.xlane.xlu0 %448 }
 0x15f   :  { %v452_v4 = vmul.f32 %v450_v2, %v450_v2  ;;  %v451_v5 = vmul.f32 0.0033333334, %v449_v3  ;;  %v457_v11 = vsub.f32 %v1922_v18, %v450_v2  ;;  %v458_v12 = vsub.f32 %v1924_v19, %v450_v2  ;;  %v597_v18 = vld [vmem:[%s2380_s3 + $0x300] sm:$0xff]  ;;  %v600_v19 = vld [vmem:[%s2380_s3 + $0x318] sm:$0xff] }
 0x160   :  { %v1374_v38 = vpack.c.bf16 %v600_v19, %v597_v18  ;;  %v459_v24 = vsub.f32 %v1926_v20, %v450_v2  ;;  %v612_v20 = vld [vmem:[%s2380_s3 + $0x378] sm:$0xf] }
 0x161   :  { %v453_v6 = vsub.f32 %v451_v5, %v452_v4  ;;  %v1383_v56 = vpack.c.bf16 %v612_v20, %v609_v33  ;;  %v50_v5 = vld [vmem:[%s2381_s4] sm:$0x7] }
 0x163   :  { %v454_v7 = vmax.f32 %v453_v6, 0.0  ;;  %v627_v6 = vrot.slane %v50_v5, %v1794_v22 }
 0x165   :  { %v455_v8 = vadd.f32 1e-05, %v454_v7  ;;  %v619_v7 = vrot.slane %v50_v5, %v1792_v21 }
 0x167   :  { %1515 = vrsqrt.f32 %v455_v8  ;;  %v623_v8 = vrot.slane %v50_v5, %v1796_v23 }
 0x171   :  { %v1516_v14 = vpop.eup %1515 }
 0x172   :  { %v461_v36 = vmul.f32 %v1516_v14, %v458_v12  ;;  %v460_v16 = vmul.f32 %v1516_v14, %v457_v11  ;;  %v462_v50 = vmul.f32 %v1516_v14, %v459_v24  ;;  %v1434_v24 = vpack.c.bf16 %v969_v47, %v968_v46 }
 0x174   :  { %v480_v27 = vmul.f32 %v2115_v13, %v461_v36  ;;  %v479_v28 = vmul.f32 %v2118_v35, %v460_v16  ;;  %v481_v57 = vmul.f32 %v2171_v51, %v462_v50  ;;  %v970_v50 = vld [vmem:[%s2384_s7 + $0x20] sm:$0xff] }
 0x176   :  { %v499_v32 = vadd.f32 %v2121_v15, %v480_v27  ;;  %v498_v34 = vadd.f32 %v2124_v63, %v479_v28  ;;  %v500_v59 = vadd.f32 %v2191_v58, %v481_v57 }
 0x178   :  { %709 = vmatprep.mubr.f32.mxu0 %v499_v32  ;;  %851 = vmatprep.mubr.f32.mxu1 %v499_v32 }
 0x179   :  { %710 = vmatmul.mubr.f32.vlgmr.msra.gmra.mrb[0].mxu0 %v498_v34  ;;  %852 = vmatmul.mubr.f32.vlgmr.msra.gmra.mrb[0].mxu1 %v498_v34 }
 0x17a   :  { %1375 = vmatpush1.bf16.msra.mxu0 %v1374_v38  ;;  %1420 = vmatpush3.bf16.msra.mxu1 %v1419_v30 }
 0x17b   :  { %1377 = vmatprep.subr.bf16.mxu0 %v1376_v40  ;;  %1421 = vmatprep.subr.bf16.mxu1 %v1590_v1 }
 0x17c   :  { %780 = vmatprep.mubr.f32.mxu0 %v1592_v55  ;;  %1290 = vmatprep.mubr.msk.f32.mxu1 %vm1593_vm5, %v1592_v55 }
 0x17e   :  { %1379 = vmatpush1.bf16.msra.mxu0 %v1378_v48  ;;  %1423 = vmatpush3.bf16.msra.mxu1 %v1422_v49  ;;  %v986_v48 = vld [vmem:[%s2384_s7 + $0xa0] sm:$0xff]  ;;  %v987_v49 = vld [vmem:[%s2384_s7 + $0xa8] sm:$0xff] }
 0x17f   :  { %1382 = vmatprep.subr.msk.bf16.mxu0 %vm2184_vm4, %v1380_v25  ;;  %1424 = vmatprep.subr.bf16.mxu1 %v1590_v1  ;;  %v1436_v33 = vpack.c.bf16 %v987_v49, %v986_v48  ;;  %v971_v25 = vld [vmem:[%s2384_s7 + $0x28] sm:$0xff] }
 0x180   :  { %v1438_v20 = vpack.c.bf16 %v971_v25, %v970_v50 }
 0x182   :  { %1385 = vmatpush1.bf16.msk.msra.mxu0 %vm2184_vm4, %v1383_v56  ;;  %1427 = vmatpush3.bf16.msk.msra.mxu1 %vm2184_vm4, %v1425_v26  ;;  %v972_v56 = vld [vmem:[%s2384_s7 + $0x30] sm:$0xff]  ;;  %v973_v26 = vld [vmem:[%s2384_s7 + $0x38] sm:$0xff] }
 0x183   :  { %1460 = vmatprep.subr.bf16.mxu0 %v1590_v1  ;;  %1429 = vmatprep.subr.bf16.mxu1 %v1428_v62  ;;  %v1442_v57 = vpack.c.bf16 %v973_v26, %v972_v56  ;;  %v975_v62 = vld [vmem:[%s2384_s7 + $0x48] sm:$0xff] }
 0x185   :  { %1188 = vmatmul.mubr.msk.f32.vlgmr.msra.gmra.mrb[0].mxu0 %vm631_vm6, %v500_v59  ;;  %1291 = vmatmul.mubr.msk.f32.vlgmr.msra.gmra.mrb[2].mxu1 %vm631_vm6, %v500_v59  ;;  %v990_v59 = vld [vmem:[%s2384_s7 + $0xc0] sm:$0xff] }
 0x186   :  { %1305 = vmatprep.mubr.msk.f32.mxu0 %vm1593_vm5, %v1592_v55  ;;  %1431 = vmatpush3.bf16.msra.mxu1 %v1430_v37  ;;  %v1440_v55 = vpack.c.bf16 %v989_v53, %v988_v52  ;;  %v1444_v60 = vpack.c.bf16 %v991_v41, %v990_v59  ;;  %v1446_v37 = vpack.c.bf16 %v975_v62, %v974_v61 }
 0x187   :  { %1433 = vmatprep.subr.bf16.mxu1 %v1432_v45 }
 0x18a   :  { %1435 = vmatpush3.bf16.msra.mxu1 %v1434_v24 }
 0x18b   :  { %1437 = vmatprep.subr.bf16.mxu1 %v1436_v33 }
 0x18e   :  { %1439 = vmatpush3.bf16.msra.mxu1 %v1438_v20 }
 0x18f   :  { %1441 = vmatprep.subr.bf16.mxu1 %v1440_v55 }
 0x192   :  { %1443 = vmatpush3.bf16.msra.mxu1 %v1442_v57 }
 0x193   :  { %1445 = vmatprep.subr.bf16.mxu1 %v1444_v60 }
 0x196   :  { %1447 = vmatpush3.bf16.msra.mxu1 %v1446_v37 }
 0x24c   :  { %v1226_v2 = vpop.f32.mrb[0].mxu1 }
 0x24d   :  { %v1227_v3 = vpop.f32.mrb[1].mxu1 }
 0x24e   :  { %v1228_v4 = vadd.f32 %v1227_v3, %v1226_v2  ;;  %v993_v2 = vld [vmem:[%s2384_s7 + $0xd8] sm:$0xff]  ;;  %v998_v3 = vld [vmem:[%s2384_s7 + $0x100] sm:$0xff] }
 0x24f   :  { %v1448_v5 = vpack.c.bf16 %v993_v2, %v992_v0 }
 0x250   :  { %v854_v9 = vadd.f32 %v1228_v4, %v627_v6  ;;  %v999_v4 = vld [vmem:[%s2384_s7 + $0x108] sm:$0xff] }
 0x251   :  { %v1461_v6 = vpack.c.bf16 %v999_v4, %v998_v3  ;;  %1449 = vmatprep.subr.bf16.mxu1 %v1448_v5 }
 0x253   :  { %1462 = vmatpush3.bf16.msra.mxu0 %v1461_v6 }
 0x254   :  { %1463 = vmatprep.subr.bf16.mxu0 %v1590_v1 }
 0x258   :  { %v782_v10 = vpop.f32.mrb[0].mxu0  ;;  %v923_v11 = vpop.f32.mrb[2].mxu1 }
 0x259   :  { %v1470_v12 = vadd.f32 %v782_v10, %v619_v7  ;;  %v924_v14 = vadd.f32 %v923_v11, %v854_v9  ;;  %v784_v36 = vpop.f32.mrb[1].mxu0  ;;  %v1292_v16 = vpop.f32.mrb[3].mxu1  ;;  %v976_v7 = vld [vmem:[%s2384_s7 + $0x50] sm:$0xff]  ;;  %v994_v9 = vld [vmem:[%s2384_s7 + $0xe0] sm:$0xff]  ;;  %v995_v11 = vld [vmem:[%s2384_s7 + $0xe8] sm:$0xff] }
 0x25a   :  { %v1471_v18 = vadd.f32 %v784_v36, %v623_v8  ;;  %v977_v8 = vld [vmem:[%s2384_s7 + $0x58] sm:$0xff]  ;;  %v1452_v36 = vpack.c.bf16 %v995_v11, %v994_v9 }
 0x25b   :  { %v2223_v19 = vmax.f32 %v1470_v12, 0.0  ;;  %v2225_v43 = vmax.f32 %v924_v14, 0.0  ;;  %v1450_v10 = vpack.c.bf16 %v977_v8, %v976_v7  ;;  %v1000_v12 = vld [vmem:[%s2384_s7 + $0x110] sm:$0xff]  ;;  %v1001_v14 = vld [vmem:[%s2384_s7 + $0x118] sm:$0xff] }
 0x25c   :  { %v2227_v17 = vmax.f32 %v1471_v18, 0.0  ;;  %v1464_v16 = vpack.c.bf16 %v1001_v14, %v1000_v12  ;;  %v978_v18 = vld [vmem:[%s2384_s7 + $0x60] sm:$0xff] }
 0x25d   :  { %v937_v22 = vmul.f32 %v2223_v19, %v2223_v19  ;;  %v930_v21 = vsel %vm431_vm0, %v2223_v19, 0.0  ;;  %v939_v28 = vmul.f32 %v2225_v43, %v2225_v43  ;;  %v933_v32 = vsel %vm435_vm1, %v2225_v43, 0.0  ;;  %1451 = vmatpush3.bf16.msra.mxu1 %v1450_v10 }
 0x25e   :  { %v938_v23 = vmul.f32 %v2227_v17, %v2227_v17  ;;  %v931_v27 = vsel %vm431_vm0, %v2227_v17, 0.0  ;;  %1453 = vmatprep.subr.bf16.mxu1 %v1452_v36  ;;  %1465 = vmatpush3.bf16.msra.mxu0 %v1464_v16 }
 0x25f   :  { %v932_v29 = vadd.f32 %v931_v27, %v930_v21  ;;  %v940_v31 = vsel %vm431_vm0, %v937_v22, 0.0  ;;  %v943_v39 = vsel %vm435_vm1, %v939_v28, 0.0  ;;  %v979_v22 = vld [vmem:[%s2384_s7 + $0x68] sm:$0xff]  ;;  %v996_v21 = vld [vmem:[%s2384_s7 + $0xf0] sm:$0xff]  ;;  %v1002_v27 = vld [vmem:[%s2384_s7 + $0x120] sm:$0xff]  ;;  %1466 = vmatprep.subr.bf16.mxu0 %v1590_v1 }
 0x260   :  { %v941_v34 = vsel %vm431_vm0, %v938_v23, 0.0  ;;  %v997_v23 = vld [vmem:[%s2384_s7 + $0xf8] sm:$0xff]  ;;  %v1003_v28 = vld [vmem:[%s2384_s7 + $0x128] sm:$0xf] }
 0x261   :  { %v934_v38 = vadd.f32 %v933_v32, %v932_v29  ;;  %v942_v30 = vadd.f32 %v941_v34, %v940_v31  ;;  %v1454_v29 = vpack.c.bf16 %v979_v22, %v978_v18  ;;  %v1456_v31 = vpack.c.bf16 %v997_v23, %v996_v21  ;;  %v980_v34 = vld [vmem:[%s2384_s7 + $0x70] sm:$0xff] }
 0x262   :  { %v1467_v32 = vpack.c.bf16 %v1003_v28, %v1002_v27 }
 0x263   :  { %935 = vadd.xlane.f32.xlu0 %v934_v38  ;;  %v944_v40 = vadd.f32 %v943_v39, %v942_v30  ;;  %v981_v38 = vld [vmem:[%s2384_s7 + $0x78] sm:$0xff]  ;;  %1455 = vmatpush3.bf16.msra.mxu1 %v1454_v29 }
 0x264   :  { %v1458_v30 = vpack.c.bf16 %v981_v38, %v980_v34  ;;  %1457 = vmatprep.subr.bf16.mxu1 %v1456_v31  ;;  %1469 = vmatpush3.bf16.msk.msra.mxu0 %vm2184_vm4, %v1467_v32 }
 0x265   :  { %945 = vadd.xlane.f32.xlu1 %v944_v40 }
 0x267   :  { %1459 = vmatpush3.bf16.msra.mxu1 %v1458_v30 }
 0x2f0   :  { %v936_v39 = vpop.xlane.xlu0 %935 }
 0x2f1   :  { %v947_v40 = vmul.f32 0.0033333334, %v936_v39 }
 0x2f2   :  { %v946_v42 = vpop.xlane.xlu1 %945 }
 0x2f3   :  { %v948_v44 = vmul.f32 0.0033333334, %v946_v42  ;;  %v949_v45 = vmul.f32 %v947_v40, %v947_v40  ;;  %v954_v48 = vsub.f32 %v2223_v19, %v947_v40  ;;  %v955_v1 = vsub.f32 %v2227_v17, %v947_v40 }
 0x2f4   :  { %v956_v49 = vsub.f32 %v2225_v43, %v947_v40 }
 0x2f5   :  { %v950_v46 = vsub.f32 %v948_v44, %v949_v45 }
 0x2f7   :  { %v951_v47 = vmax.f32 %v950_v46, 0.0 }
 0x2f9   :  { %v952_v24 = vadd.f32 1e-05, %v951_v47 }
 0x2fb   :  { %1517 = vrsqrt.f32 %v952_v24 }
 0x305   :  { %v1518_v33 = vpop.eup %1517 }
 0x306   :  { %v958_v50 = vmul.f32 %v1518_v33, %v955_v1  ;;  %v959_v54 = vmul.f32 %v1518_v33, %v956_v49  ;;  %v957_v25 = vmul.f32 %v1518_v33, %v954_v48 }
 0x308   :  { %v961_v20 = vmul.f32 %v958_v50, %v2115_v13  ;;  %v962_v52 = vmul.f32 %v959_v54, %v2171_v51  ;;  %v960_v53 = vmul.f32 %v957_v25, %v2118_v35  ;;  %v1191_v13 = vld [vmem:[%s2385_s8] ss:$0 sm:$0xff]  ;;  %s1594_s8 = smov [#allocation5]  }
 0x309   :  { %s1177_s6 = sshll.u32 %s1594_s8, 4  ;;  %s1178_s6 = int_to_ptr.vmem [resolvable:$true] %s1177_s6 }
 0x30a   :  { %v964_v55 = vadd.f32 %v961_v20, %v2121_v15  ;;  %v965_v56 = vadd.f32 %v962_v52, %v2191_v58  ;;  %v963_v19 = vadd.f32 %v960_v53, %v2124_v63  ;;  %s1545_s15 = scalar_lea.vmem %s1178_s6, 32  ;;  %p1550_p9 = scmp.lt.s32.totalorder %s1178_s6, %s1178_s6 }
 0x30b   :  { %p1546_p8 = scmp.ne.s32.totalorder %s1178_s6, %s1545_s15  ;;  %p1551_p10 = scmp.lt.s32.totalorder %s1545_s15, %s1545_s15 }
 0x30c   :  { %1080 = vmatprep.mubr.f32.mxu1 %v964_v55  ;;  %1306 = vmatmul.mubr.msk.f32.vlgmr.msra.gmra.mrb[2].mxu0 %vm631_vm6, %v965_v56 }
 0x30d   :  { %1081 = vmatmul.mubr.f32.vlgmr.msra.gmra.mrb[4].mxu1 %v963_v19  ;;  %p1552_p11 = por %p1551_p10, %p1550_p9 }
 0x30f   :  { %p1553_p12 = pnand %p1552_p11, %p1546_p8 }
 0x3df   :  { %v1152_v43 = vpop.f32.mrb[2].mxu0 }
 0x3e0   :  { %v1268_v17 = vpop.f32.mrb[4].mxu1  ;;  %v1307_v26 = vpop.f32.mrb[3].mxu0 }
 0x3e1   :  { %v1269_v51 = vpop.f32.mrb[5].mxu1 }
 0x3e2   :  { %v1270_v57 = vadd.f32 %v1269_v51, %v1268_v17 }
 0x3e4   :  { %v1083_v35 = vadd.f32 %v1270_v57, %v1191_v13 }
 0x3e6   :  { %v1153_v59 = vadd.f32 %v1152_v43, %v1083_v35 }
 0x3e8   :  { %v1156_v15 = vsel %vm431_vm0, %v1153_v59, -inf }
 0x3e9   :  { %1157 = vmax.xlane.f32.xlu0 %v1156_v15 }
 0x476   :  { %v1158_v58 = vpop.xlane.xlu0 %1157 }
 0x477   :  { %v1159_v63 = vsub.f32 %v1153_v59, %v1158_v58 }
 0x479   :  { %v1160_v41 = vmul.f32 1.442695, %v1159_v63 }
 0x47b   :  { %1519 = vpow2.f32 %v1160_v41 }
 0x485   :  { %v1520_v60 = vpop.eup %1519 }
 0x486   :  { %v1162_v61 = vsel %vm431_vm0, %v1520_v60, 0.0 }
 0x487   :  { %1163 = vadd.xlane.f32.xlu1 %v1162_v61 }
 0x514   :  { %v1164_v62 = vpop.xlane.xlu1 %1163 }
 0x515   :  { %1521 = vrcp.f32 %v1164_v62 }
 0x51f   :  { %v1522_v0 = vpop.eup %1521 }
 0x520   :  { %v1166_v37 = vmul.f32 %v1522_v0, %v1164_v62 }
 0x522   :  { %v1167_v2 = vsub.f32 2.0, %v1166_v37 }
 0x524   :  { %v1168_v3 = vmul.f32 %v1522_v0, %v1167_v2 }
 0x526   :  { %v1169_v4 = vmul.f32 %v1520_v60, %v1168_v3 }
 0x528   :  { %1170 = vst [vmem:[#allocation5] sm:$0x3] %v1169_v4 }
 0x529   :  { %1556 = shalt.err (!%p1553_p12)
}
 0x52a   :  { %s1557_s18 = scalar_lea.hbm %s2386_s9, 32 }
 0x52b   :  { %p1558_p13 = scmp.ne.s32.totalorder %s2386_s9, %s1557_s18  ;;  %p1561_p0 = scmp.lt.u32.totalorder %s1557_s18, %s2386_s9 }
 0x52d   :  { %p1563_p1 = pnand %p1561_p0, %p1558_p13 }
 0x52f   :  { %1566 = shalt.err (!%p1563_p1)
}
 0x530   :  { %1180 = dma.vmem_to_hbm [thread:$0]  %s1178_s6, 32, %s2386_s9, [#allocation4]  }
 0x531   :  { %1569 = dma.done.wait [#allocation4], 32  }
 0x532   :  { %1570 = vsyncadd [#allocation4], 4294967264 }
 0x533   :  { %1184 = vsyncpa [#allocation3], 1 }
 0x534   :  { %1185 = vsyncpa [#allocation4], 1 }

</bundles_post_ra>
